<compile_context>
chip_gen: v7x
topology: tpu7x:2x2x1
jax: 0.10.0
libtpu: 0.0.40
codegen_flags: <defaults>
</compile_context>

<pallas_src>
import functools

import jax
import jax.numpy as jnp
from jax.experimental import pallas as pl
from jax.experimental.pallas import tpu as pltpu

dropout_p = 0.2
head_size = 64
num_heads = 6
n_embd = num_heads * head_size  # 384


def _round_up(x, m):
    return (x + m - 1) // m * m


def _ffn_kernel(seed_ref, x_ref, w1_ref, b1_ref, w2_ref, b2_ref, o_ref, *,
                training: bool, p: float):
    # Cast the f32 x tile to bf16 *inside* the kernel (VPU work hidden under the MXU); avoids a
    # separate wrapper-side XLA cast pass (extra HBM read+write) over x.
    x = x_ref[...].astype(w1_ref.dtype)

    # Two bf16 MXU matmuls with f32 accumulation; bias adds + ReLU on the VPU, all in VMEM.
    h = jnp.dot(x, w1_ref[...], preferred_element_type=jnp.float32)
    h = h + b1_ref[...]                                   # f32 bias
    h = jnp.maximum(h, 0.0)                               # ReLU
    y = jnp.dot(h.astype(w2_ref.dtype), w2_ref[...],
                preferred_element_type=jnp.float32)
    y = y + b2_ref[...]

    if training:
        # Inverted dropout from the TPU hardware PRNG (matches torch's 1/(1-p) scaling).
        # keep iff bits >= floor(p * 2^32): the keep probability is within 2^-32 of (1 - p),
        # i.e. negligibly above it for p = 0.2.
        # Seed words: (per-call seed, block id) so different calls / blocks are decorrelated.
        pltpu.prng_seed(seed_ref[0], pl.program_id(0))
        bits = pltpu.bitcast(pltpu.prng_random_bits(y.shape), jnp.uint32)
        threshold = jnp.uint32(int(p * (1 << 32)))
        scale = jnp.float32(1.0 / (1.0 - p))
        y = jnp.where(bits >= threshold, y * scale, 0.0)

    o_ref[...] = y.astype(o_ref.dtype)


def feed_forward(x, w1, b1, w2, b2, *, training=False, seed=0, block_m=None):
    """x: (B, T, C); w1: (C, 4C); b1: (1, 4C); w2: (4C, C); b2: (1, C).

    Weights are stored as (in_features, out_features), i.e. the transpose of nn.Linear.weight,
    so the kernel computes plain row-major matmuls on the MXU.
    """
    B, T, C = x.shape
    H = w1.shape[1]
    M = B * T

    if block_m is None:
        if M <= 512:
            # One full-M tile: not enough rows to amortize an extra grid step.
            block_m = M
        else:
            # >= 2 blocks (keeps both v7x TensorCores busy via the "parallel" axis), a multiple
            # of 256 for MXU occupancy, capped at 2048 rows so the live VMEM set (~35 MiB,
            # dominated by the f32 (block_m, 4C) intermediate) stays under v7x's 64 MiB.
            block_m = min(2048, _round_up(pl.cdiv(M, 2), 256))
    num_blocks = pl.cdiv(M, block_m)  # last block may be partial: reads padded, writes masked.

    x2 = x.reshape(M, C)  # stays f32; cast to bf16 happens inside the kernel.

    compute_dtype = jnp.bfloat16
    w1c = w1.astype(compute_dtype)
    w2c = w2.astype(compute_dtype)
    b1c = b1.astype(jnp.float32)
    b2c = b2.astype(jnp.float32)

    kernel = functools.partial(_ffn_kernel, training=training, p=dropout_p)

    # Rough VMEM footprint of one grid step (double-buffered streams + resident weights),
    # used to raise the scoped-VMEM limit just enough (<= 48 MiB: safe on v5e/v6e/v7x).
    itemsize = x2.dtype.itemsize
    vmem_est = (2 * block_m * C * itemsize          # x tiles (double-buffered, f32)
                + 2 * block_m * C * x.dtype.itemsize  # out tiles (double-buffered, f32)
                + block_m * H * 4                   # h intermediate, f32
                + block_m * H * 2                   # h cast to bf16 for matmul-2
                + 2 * (C * H + H * C) * 2           # W1 + W2 bf16 (double-buffered)
                + 2 * (H + C) * 4)                  # biases, f32
    vmem_limit = int(min(48 << 20, max(32 << 20, int(vmem_est * 1.25))))

    # FLOPs: two matmuls over all grid steps; bytes: streamed x/out + resident weights/biases.
    m_total = num_blocks * block_m
    flops = 2 * m_total * C * H * 2
    bytes_accessed = (M * C * itemsize              # x in (f32)
                      + C * H * w1c.dtype.itemsize  # W1
                      + H * C * w2c.dtype.itemsize  # W2
                      + H * 4 + C * 4               # biases (f32)
                      + M * C * x.dtype.itemsize)   # out (f32)
    cost = pl.CostEstimate(flops=flops, transcendentals=0,
                           bytes_accessed=bytes_accessed)

    out = pl.pallas_call(
        kernel,
        out_shape=jax.ShapeDtypeStruct((M, C), x.dtype),
        grid_spec=pltpu.PrefetchScalarGridSpec(
            num_scalar_prefetch=1,                               # seed lands in SMEM
            grid=(num_blocks,),
            in_specs=[
                pl.BlockSpec((block_m, C), lambda i, seed: (i, 0)),  # x tile (streamed, f32)
                pl.BlockSpec((C, H), lambda i, seed: (0, 0)),        # W1 (resident, bf16)
                pl.BlockSpec((1, H), lambda i, seed: (0, 0)),        # b1 (f32)
                pl.BlockSpec((H, C), lambda i, seed: (0, 0)),        # W2 (resident, bf16)
                pl.BlockSpec((1, C), lambda i, seed: (0, 0)),        # b2 (f32)
            ],
            out_specs=pl.BlockSpec((block_m, C), lambda i, seed: (i, 0)),
        ),
        compiler_params=pltpu.CompilerParams(
            dimension_semantics=("parallel",),                   # no carry across M blocks
            vmem_limit_bytes=vmem_limit),
        cost_estimate=cost,
    )(jnp.array([seed], jnp.int32), x2, w1c, b1c, w2c, b2c)

    return out.reshape(B, T, C)


def _reference_bf16(x2, w1, b1, w2, b2):
    # Same numerics as the kernel: bf16 matmul inputs, f32 accumulation, f32 bias/ReLU.
    xb = x2.astype(jnp.bfloat16)
    w1b = w1.astype(jnp.bfloat16)
    w2b = w2.astype(jnp.bfloat16)
    h = jnp.dot(xb, w1b, preferred_element_type=jnp.float32) + b1
    h = jnp.maximum(h, 0.0)
    y = jnp.dot(h.astype(jnp.bfloat16), w2b, preferred_element_type=jnp.float32) + b2
    return y


if __name__ == "__main__":
    key = jax.random.PRNGKey(0)
    k1, k2, k3, k4, kx, kx2 = jax.random.split(key, 6)

    # Deterministic parameter init (same distribution family as nn.Linear default:
    # U(-1/sqrt(fan_in), 1/sqrt(fan_in))).
    hidden = 4 * n_embd
    bound1 = 1.0 / (n_embd ** 0.5)
    bound2 = 1.0 / (hidden ** 0.5)
    w1 = jax.random.uniform(k1, (n_embd, hidden), jnp.float32, -bound1, bound1)
    b1 = jax.random.uniform(k2, (1, hidden), jnp.float32, -bound1, bound1)
    w2 = jax.random.uniform(k3, (hidden, n_embd), jnp.float32, -bound2, bound2)
    b2 = jax.random.uniform(k4, (1, n_embd), jnp.float32, -bound2, bound2)

    # Test 1: small input (batch=2, seq=8, embed=384) -> single full-M tile.
    x = jax.random.normal(kx, (2, 8, n_embd), jnp.float32)
    out = jax.block_until_ready(feed_forward(x, w1, b1, w2, b2, training=False))
    ref = _reference_bf16(x.reshape(-1, n_embd), w1, b1, w2, b2).reshape(x.shape)
    assert out.shape == x.shape and out.dtype == x.dtype
    assert jnp.allclose(out, ref.astype(out.dtype), atol=1e-2, rtol=1e-2), \
        "mismatch vs reference (small)"

    # Test 2: ragged M (2*300=600 rows) -> 2 blocks of 512, last block partial (masked writes).
    xr = jax.random.normal(kx2, (2, 300, n_embd), jnp.float32)
    outr = jax.block_until_ready(feed_forward(xr, w1, b1, w2, b2, training=False))
    refr = _reference_bf16(xr.reshape(-1, n_embd), w1, b1, w2, b2).reshape(xr.shape)
    assert outr.shape == xr.shape and outr.dtype == xr.dtype
    assert jnp.allclose(outr, refr.astype(outr.dtype), atol=1e-2, rtol=1e-2), \
        "mismatch vs reference (ragged multi-block)"

    print("KERNEL_OK")
</pallas_src>

<mosaic_0001>
module attributes {stable_mosaic.version = 11 : i64} {
  func.func @_ffn_kernel(%arg0: i32, %arg1: memref<1xi32, #tpu.memory_space<smem>>, %arg2: memref<16x384xf32, #tpu.memory_space<vmem>>, %arg3: memref<384x1536xbf16, #tpu.memory_space<vmem>>, %arg4: memref<1x1536xf32, #tpu.memory_space<vmem>>, %arg5: memref<1536x384xbf16, #tpu.memory_space<vmem>>, %arg6: memref<1x384xf32, #tpu.memory_space<vmem>>, %arg7: memref<16x384xf32, #tpu.memory_space<vmem>>) attributes {dimension_semantics = [#tpu.dimension_semantics<parallel>], iteration_bounds = array<i64: 1>, scalar_prefetch = 1 : i64, scratch_operands = 0 : i64, tpu.core_type = #tpu.core_type<tc>, window_params = [{transform_indices = @transform_0, window_bounds = array<i64: 16, 384>}, {pipeline_mode = #tpu.pipeline_mode<synchronous>, transform_indices = @transform_1, window_bounds = array<i64: 384, 1536>}, {pipeline_mode = #tpu.pipeline_mode<synchronous>, transform_indices = @transform_2, window_bounds = array<i64: 1, 1536>}, {pipeline_mode = #tpu.pipeline_mode<synchronous>, transform_indices = @transform_3, window_bounds = array<i64: 1536, 384>}, {pipeline_mode = #tpu.pipeline_mode<synchronous>, transform_indices = @transform_4, window_bounds = array<i64: 1, 384>}, {transform_indices = @transform_5, window_bounds = array<i64: 16, 384>}]} {
    %c0 = arith.constant 0 : index
    %c0_0 = arith.constant 0 : index
    %0 = vector.load %arg2[%c0, %c0_0] : memref<16x384xf32, #tpu.memory_space<vmem>>, vector<16x384xf32>
    %1 = arith.truncf %0 : vector<16x384xf32> to vector<16x384xbf16>
    %c0_1 = arith.constant 0 : index
    %c0_2 = arith.constant 0 : index
    %2 = vector.load %arg3[%c0_1, %c0_2] : memref<384x1536xbf16, #tpu.memory_space<vmem>>, vector<384x1536xbf16>
    %cst = arith.constant dense<0.000000e+00> : vector<16x1536xf32>
    %3 = tpu.matmul %1, %2, %cst {dimension_numbers = #tpu.dot_dimension_numbers<[1], [0], [0], [1], [0, 0, 1, 1], [], []>} : vector<16x384xbf16>, vector<384x1536xbf16>, vector<16x1536xf32> -> vector<16x1536xf32>
    %c0_3 = arith.constant 0 : index
    %c0_4 = arith.constant 0 : index
    %4 = vector.load %arg4[%c0_3, %c0_4] : memref<1x1536xf32, #tpu.memory_space<vmem>>, vector<1x1536xf32>
    %5 = vector.broadcast %4 : vector<1x1536xf32> to vector<16x1536xf32>
    %6 = arith.addf %3, %5 : vector<16x1536xf32>
    %cst_5 = arith.constant 0.000000e+00 : f32
    %7 = vector.broadcast %cst_5 : f32 to vector<16x1536xf32>
    %8 = arith.maximumf %6, %7 : vector<16x1536xf32>
    %9 = arith.truncf %8 : vector<16x1536xf32> to vector<16x1536xbf16>
    %c0_6 = arith.constant 0 : index
    %c0_7 = arith.constant 0 : index
    %10 = vector.load %arg5[%c0_6, %c0_7] : memref<1536x384xbf16, #tpu.memory_space<vmem>>, vector<1536x384xbf16>
    %cst_8 = arith.constant dense<0.000000e+00> : vector<16x384xf32>
    %11 = tpu.matmul %9, %10, %cst_8 {dimension_numbers = #tpu.dot_dimension_numbers<[1], [0], [0], [1], [0, 0, 1, 1], [], []>} : vector<16x1536xbf16>, vector<1536x384xbf16>, vector<16x384xf32> -> vector<16x384xf32>
    %c0_9 = arith.constant 0 : index
    %c0_10 = arith.constant 0 : index
    %12 = vector.load %arg6[%c0_9, %c0_10] : memref<1x384xf32, #tpu.memory_space<vmem>>, vector<1x384xf32>
    %13 = vector.broadcast %12 : vector<1x384xf32> to vector<16x384xf32>
    %14 = arith.addf %11, %13 : vector<16x384xf32>
    %c0_11 = arith.constant 0 : index
    %c0_12 = arith.constant 0 : index
    %15 = vector.load %arg7[%c0_11, %c0_12] : memref<16x384xf32, #tpu.memory_space<vmem>>, vector<16x384xf32>
    tpu.vector_store %arg7[%c0_11, %c0_12], %14 {strides = array<i32>} : memref<16x384xf32, #tpu.memory_space<vmem>>, vector<16x384xf32>,
    return
  }
  func.func @transform_0(%arg0: i32, %arg1: memref<1xi32, #tpu.memory_space<smem>>) -> (i32, i32) {
    %c0_i32 = arith.constant 0 : i32
    %c0_i32_0 = arith.constant 0 : i32
    return %arg0, %c0_i32 : i32, i32
  }
  func.func @transform_1(%arg0: i32, %arg1: memref<1xi32, #tpu.memory_space<smem>>) -> (i32, i32) {
    %c0_i32 = arith.constant 0 : i32
    %c0_i32_0 = arith.constant 0 : i32
    %c0_i32_1 = arith.constant 0 : i32
    return %c0_i32, %c0_i32_0 : i32, i32
  }
  func.func @transform_2(%arg0: i32, %arg1: memref<1xi32, #tpu.memory_space<smem>>) -> (i32, i32) {
    %c0_i32 = arith.constant 0 : i32
    %c0_i32_0 = arith.constant 0 : i32
    %c0_i32_1 = arith.constant 0 : i32
    return %c0_i32, %c0_i32_0 : i32, i32
  }
  func.func @transform_3(%arg0: i32, %arg1: memref<1xi32, #tpu.memory_space<smem>>) -> (i32, i32) {
    %c0_i32 = arith.constant 0 : i32
    %c0_i32_0 = arith.constant 0 : i32
    %c0_i32_1 = arith.constant 0 : i32
    return %c0_i32, %c0_i32_0 : i32, i32
  }
  func.func @transform_4(%arg0: i32, %arg1: memref<1xi32, #tpu.memory_space<smem>>) -> (i32, i32) {
    %c0_i32 = arith.constant 0 : i32
    %c0_i32_0 = arith.constant 0 : i32
    %c0_i32_1 = arith.constant 0 : i32
    return %c0_i32, %c0_i32_0 : i32, i32
  }
  func.func @transform_5(%arg0: i32, %arg1: memref<1xi32, #tpu.memory_space<smem>>) -> (i32, i32) {
    %c0_i32 = arith.constant 0 : i32
    %c0_i32_0 = arith.constant 0 : i32
    return %arg0, %c0_i32 : i32, i32
  }
}

</mosaic_0001>

<bundles_post_ra>
// kernel: tpu_custom_call.1
= control target key start
LH: loop header
LB: loop body
LE: loop exit
PB: predicated region body
PF: predicated region fallthrough
CT: control target
= control target key end

     0   :  { %12 = vsyncpa [#allocation5], 0  ;;  %s6892_s0 = inlined_call_operand.<no memory space> [shape: s32[1], index: 0, kind: input, shape index: {}]   ;;  %s6893_s1 = inlined_call_operand.hbm [shape: f32[16,384], index: 1, kind: input, shape index: {}]   ;;  %s6894_s2 = inlined_call_operand.hbm [shape: bf16[384,1536], index: 2, kind: input, shape index: {}]   ;;  %s6895_s3 = inlined_call_operand.hbm [shape: f32[1,1536], index: 3, kind: input, shape index: {}]   ;;  %s6896_s4 = inlined_call_operand.hbm [shape: bf16[1536,384], index: 4, kind: input, shape index: {}]   ;;  %s6897_s5 = inlined_call_operand.hbm [shape: f32[1,384], index: 5, kind: input, shape index: {}]   ;;  %s6898_s6 = inlined_call_operand.hbm [shape: f32[16,384], index: 6, kind: output, shape index: {}]  }
   0x1   :  { %13 = vsyncpa [#allocation8], 0 }
   0x2   :  { %14 = vsyncpa [#allocation11], 0 }
   0x3   :  { %15 = vsyncpa [#allocation6], 0  ;;  %s6657_s0 = smov [#allocation7]   ;;  %s6517_s24 = scalar_lea.hbm %s6894_s2, 36864 }
   0x4   :  { %s33_s21 = sshll.u32 %s6657_s0, 4  ;;  %p6518_p0 = scmp.ne.s32.totalorder %s6894_s2, %s6517_s24  ;;  %s34_s21 = int_to_ptr.vmem [resolvable:$true] %s33_s21 }
   0x5   :  { %p6521_p1 = scmp.lt.u32.totalorder %s6517_s24, %s6894_s2 }
   0x7   :  { %p6523_p2 = pnand %p6521_p1, %p6518_p0 }
   0x9   :  { %6526 = shalt.err (!%p6523_p2)
}
   0xa   :  { %s6527_s29 = scalar_lea.vmem %s34_s21, 36864  ;;  %p6532_p4 = scmp.lt.s32.totalorder %s34_s21, %s34_s21 }
   0xb   :  { %p6528_p3 = scmp.ne.s32.totalorder %s34_s21, %s6527_s29  ;;  %p6533_p5 = scmp.lt.s32.totalorder %s6527_s29, %s6527_s29 }
   0xd   :  { %p6534_p6 = por %p6533_p5, %p6532_p4 }
   0xf   :  { %p6535_p7 = pnand %p6534_p6, %p6528_p3 }
  0x11   :  { %6538 = shalt.err (!%p6535_p7)
}
  0x12   :  { %s6658_s30 = smov 768   ;;  %s6659_s7 = smov 48  }
  0x13   :  { %39 = dma.hbm_to_vmem [thread:$0]  %s6894_s2, 36864, %s34_s21, [#allocation8], %s6658_s30, %s6658_s30, %s6659_s7  }
  0x14   :  { %s6660_s10 = smov [#allocation10]   ;;  %s6539_s14 = scalar_lea.hbm %s6896_s4, 36864 }
  0x15   :  { %s55_s11 = sshll.u32 %s6660_s10, 4  ;;  %p6540_p8 = scmp.ne.s32.totalorder %s6896_s4, %s6539_s14  ;;  %s56_s11 = int_to_ptr.vmem [resolvable:$true] %s55_s11 }
  0x16   :  { %p6543_p9 = scmp.lt.u32.totalorder %s6539_s14, %s6896_s4 }
  0x18   :  { %p6545_p10 = pnand %p6543_p9, %p6540_p8 }
  0x1a   :  { %6548 = shalt.err (!%p6545_p10)
}
  0x1b   :  { %s6549_s19 = scalar_lea.vmem %s56_s11, 36864  ;;  %p6554_p12 = scmp.lt.s32.totalorder %s56_s11, %s56_s11 }
  0x1c   :  { %p6550_p11 = scmp.ne.s32.totalorder %s56_s11, %s6549_s19  ;;  %p6555_p13 = scmp.lt.s32.totalorder %s6549_s19, %s6549_s19 }
  0x1e   :  { %p6556_p0 = por %p6555_p13, %p6554_p12 }
  0x20   :  { %p6557_p1 = pnand %p6556_p0, %p6550_p11 }
  0x22   :  { %6560 = shalt.err (!%p6557_p1)
}
  0x23   :  { %s6661_s2 = smov 192   ;;  %s6662_s20 = smov 12  }
  0x24   :  { %61 = dma.hbm_to_vmem [thread:$0]  %s6896_s4, 36864, %s56_s11, [#allocation11], %s6661_s2, %s6661_s2, %s6662_s20  }
  0x25   :  { %s6663_s22 = smov [#allocation4]   ;;  %s6561_s26 = scalar_lea.hbm %s6893_s1, 768 }
  0x26   :  { %s21_s23 = sshll.u32 %s6663_s22, 4  ;;  %p6562_p2 = scmp.ne.s32.totalorder %s6893_s1, %s6561_s26  ;;  %s22_s23 = int_to_ptr.vmem [resolvable:$true] %s21_s23 }
  0x27   :  { %p6565_p3 = scmp.lt.u32.totalorder %s6561_s26, %s6893_s1 }
  0x29   :  { %p6567_p4 = pnand %p6565_p3, %p6562_p2 }
  0x2b   :  { %6570 = shalt.err (!%p6567_p4)
}
  0x2c   :  { %s6571_s7 = scalar_lea.vmem %s22_s23, 768  ;;  %p6576_p6 = scmp.lt.s32.totalorder %s22_s23, %s22_s23 }
  0x2d   :  { %p6572_p5 = scmp.ne.s32.totalorder %s22_s23, %s6571_s7  ;;  %p6577_p7 = scmp.lt.s32.totalorder %s6571_s7, %s6571_s7 }
  0x2f   :  { %p6578_p8 = por %p6577_p7, %p6576_p6 }
  0x31   :  { %p6579_p9 = pnand %p6578_p8, %p6572_p5 }
  0x33   :  { %6582 = shalt.err (!%p6579_p9)
}
  0x34   :  { %s6664_s4 = smov 384   ;;  %s6665_s8 = smov 24  }
  0x35   :  { %27 = dma.hbm_to_vmem [thread:$0]  %s6893_s1, 768, %s22_s23, [#allocation5], %s6664_s4, %s6664_s4, %s6665_s8  }
  0x36   :  { %s6666_s11 = smov [#allocation9]   ;;  %s6667_s13 = smov [#allocation12]  }
  0x37   :  { %s46_s12 = sshll.u32 %s6666_s11, 4  ;;  %s68_s14 = sshll.u32 %s6667_s13, 4  ;;  %s47_s12 = int_to_ptr.vmem [resolvable:$true] %s46_s12  ;;  %s69_s14 = int_to_ptr.vmem [resolvable:$true] %s68_s14 }
  0x38   :  { %s6583_s17 = scalar_lea.hbm %s6895_s3, 192 }
  0x39   :  { %p6584_p10 = scmp.ne.s32.totalorder %s6895_s3, %s6583_s17  ;;  %p6587_p11 = scmp.lt.u32.totalorder %s6583_s17, %s6895_s3 }
  0x3b   :  { %p6589_p12 = pnand %p6587_p11, %p6584_p10 }
  0x3d   :  { %6592 = shalt.err (!%p6589_p12)
}
  0x3e   :  { %s6593_s1 = scalar_lea.vmem %s47_s12, 192  ;;  %p6598_p0 = scmp.lt.s32.totalorder %s47_s12, %s47_s12 }
  0x3f   :  { %p6594_p13 = scmp.ne.s32.totalorder %s47_s12, %s6593_s1  ;;  %p6599_p1 = scmp.lt.s32.totalorder %s6593_s1, %s6593_s1 }
  0x41   :  { %p6600_p2 = por %p6599_p1, %p6598_p0 }
  0x43   :  { %p6601_p3 = pnand %p6600_p2, %p6594_p13 }
  0x45   :  { %6604 = shalt.err (!%p6601_p3)
}
  0x46   :  { %49 = dma.hbm_to_vmem [thread:$0]  %s6895_s3, 192, %s47_s12, [#allocation8]  }
  0x47   :  { %s6605_s24 = scalar_lea.hbm %s6897_s5, 48 }
  0x48   :  { %p6606_p4 = scmp.ne.s32.totalorder %s6897_s5, %s6605_s24  ;;  %p6609_p5 = scmp.lt.u32.totalorder %s6605_s24, %s6897_s5 }
  0x4a   :  { %p6611_p6 = pnand %p6609_p5, %p6606_p4 }
  0x4c   :  { %6614 = shalt.err (!%p6611_p6)
}
  0x4d   :  { %s6615_s29 = scalar_lea.vmem %s69_s14, 48  ;;  %s6619_s30 = scalar_lea.vmem %s69_s14, 64 }
  0x4e   :  { %p6616_p7 = scmp.ne.s32.totalorder %s69_s14, %s6615_s29  ;;  %p6620_p8 = scmp.lt.s32.totalorder %s69_s14, %s69_s14 }
  0x4f   :  { %p6621_p9 = scmp.lt.s32.totalorder %s6619_s30, %s6615_s29 }
  0x51   :  { %p6622_p10 = por %p6621_p9, %p6620_p8 }
  0x53   :  { %p6623_p11 = pnand %p6622_p10, %p6616_p7 }
  0x55   :  { %6626 = shalt.err (!%p6623_p11)
}
  0x56   :  { %71 = dma.hbm_to_vmem [thread:$0]  %s6897_s5, 48, %s69_s14, [#allocation11]  }
  0x57   :  { %6649 = dma.done.wait [#allocation5], 768  }
  0x58   :  { %6650 = vsyncadd [#allocation5], 4294966528 }
  0x59   :  { %6651 = dma.done.wait [#allocation8], 37056  }
  0x5a   :  { %6652 = vsyncadd [#allocation8], 4294930240 }
  0x5b   :  { %6653 = dma.done.wait [#allocation11], 36912  }
  0x5c   :  { %6654 = vsyncadd [#allocation11], 4294930384  ;;  %v5700_v0 = vld [vmem:[#allocation7 + $0x4] ss:$48 sps:$4 sm:$0xff]   ;;  %v5702_v1 = vld [vmem:[#allocation7] ss:$48 sps:$4 sm:$0xff]  }
  0x5d   :  { %1889 = vmatprep.subr.bf16.mxu1 %v5700_v0  ;;  %v5703_v2 = vld [vmem:[#allocation7 + $0x64] ss:$48 sps:$4 sm:$0xff]   ;;  %v5705_v3 = vld [vmem:[#allocation7 + $0x60] ss:$48 sps:$4 sm:$0xff]   ;;  %v89_v18 = vld [vmem:[#allocation4 + $0x8] sm:$0xff]  ;;  %s6669_s5 = smov [#allocation13]  }
  0x5e   :  { %1890 = vmatpush1.bf16.msra.mxu1 %v5702_v1  ;;  %v5706_v4 = vld [vmem:[#allocation7 + $0xc4] ss:$48 sps:$4 sm:$0xff]   ;;  %v5708_v5 = vld [vmem:[#allocation7 + $0xc0] ss:$48 sps:$4 sm:$0xff]   ;;  %v91_v58 = vld [vmem:[#allocation4 + $0x18] sm:$0xff]  ;;  %s4893_s9 = sshll.u32 %s6669_s5, 4  ;;  %s4894_s9 = int_to_ptr.vmem [resolvable:$true] %s4893_s9 }
  0x5f   :  { %1891 = vmatprep.subr.bf16.mxu1 %v5703_v2  ;;  %v5709_v6 = vld [vmem:[#allocation7 + $0x124] ss:$48 sps:$4 sm:$0xff]   ;;  %v5711_v7 = vld [vmem:[#allocation7 + $0x120] ss:$48 sps:$4 sm:$0xff]   ;;  %s6627_s10 = scalar_lea.vmem %s4894_s9, 768  ;;  %p6632_p13 = scmp.lt.s32.totalorder %s4894_s9, %s4894_s9 }
  0x60   :  { %v5712_v8 = vld [vmem:[#allocation7 + $0x184] ss:$48 sps:$4 sm:$0xff]   ;;  %v5714_v9 = vld [vmem:[#allocation7 + $0x180] ss:$48 sps:$4 sm:$0xff]   ;;  %p6628_p12 = scmp.ne.s32.totalorder %s4894_s9, %s6627_s10  ;;  %p6633_p0 = scmp.lt.s32.totalorder %s6627_s10, %s6627_s10 }
  0x61   :  { %v5715_v10 = vld [vmem:[#allocation7 + $0x1e4] ss:$48 sps:$4 sm:$0xff]   ;;  %v5717_v11 = vld [vmem:[#allocation7 + $0x1e0] ss:$48 sps:$4 sm:$0xff]  }
  0x62   :  { %1892 = vmatpush1.bf16.msra.mxu1 %v5705_v3  ;;  %v5718_v12 = vld [vmem:[#allocation7 + $0x244] ss:$48 sps:$4 sm:$0xff]   ;;  %v5720_v14 = vld [vmem:[#allocation7 + $0x240] ss:$48 sps:$4 sm:$0xff]   ;;  %v6668_v3 = vmov 0   ;;  %p6634_p1 = por %p6633_p0, %p6632_p13 }
  0x63   :  { %1893 = vmatprep.subr.bf16.mxu1 %v5706_v4  ;;  %v5745_v13 = vld [vmem:[#allocation7 + $0x14] ss:$48 sps:$4 sm:$0xff]   ;;  %v5749_v16 = vld [vmem:[#allocation7 + $0x10] ss:$48 sps:$4 sm:$0xff]  }
  0x64   :  { %v5721_v15 = vld [vmem:[#allocation7 + $0x2a4] ss:$48 sps:$4 sm:$0xff]   ;;  %2061 = vmatprep.subr.bf16.mxu0 %v5745_v13  ;;  %v5756_v21 = vld [vmem:[#allocation7 + $0x70] ss:$48 sps:$4 sm:$0xff]   ;;  %p6635_p2 = pnand %p6634_p1, %p6628_p12 }
  0x65   :  { %v5751_v17 = vld [vmem:[#allocation7 + $0x74] ss:$48 sps:$4 sm:$0xff]   ;;  %2062 = vmatpush1.bf16.msra.mxu0 %v5749_v16  ;;  %v5723_v22 = vld [vmem:[#allocation7 + $0x2a0] ss:$48 sps:$4 sm:$0xff]  }
  0x66   :  { %1894 = vmatpush1.bf16.msra.mxu1 %v5708_v5  ;;  %v92_v19 = vld [vmem:[#allocation4 + $0x20] sm:$0xff]  ;;  %2063 = vmatprep.subr.bf16.mxu0 %v5751_v17 }
  0x67   :  { %1895 = vmatprep.subr.bf16.mxu1 %v5709_v6  ;;  %v6768_v20 = vpack.c.bf16 %v92_v19, %v89_v18  ;;  %v5757_v23 = vld [vmem:[#allocation7 + $0xd4] ss:$48 sps:$4 sm:$0xff]   ;;  %v5762_v25 = vld [vmem:[#allocation7 + $0xd0] ss:$48 sps:$4 sm:$0xff]  }
  0x68   :  { %v5724_v24 = vld [vmem:[#allocation7 + $0x304] ss:$48 sps:$4 sm:$0xff]   ;;  %v5726_v27 = vld [vmem:[#allocation7 + $0x300] ss:$48 sps:$4 sm:$0xff]  }
  0x69   :  { %1921 = vmatprep.mubr.bf16.mxu1 %v6768_v20  ;;  %2064 = vmatpush1.bf16.msra.mxu0 %v5756_v21  ;;  %v5763_v26 = vld [vmem:[#allocation7 + $0x134] ss:$48 sps:$4 sm:$0xff]   ;;  %v5768_v29 = vld [vmem:[#allocation7 + $0x130] ss:$48 sps:$4 sm:$0xff]  }
  0x6a   :  { %1896 = vmatpush1.bf16.msra.mxu1 %v5711_v7  ;;  %2065 = vmatprep.subr.bf16.mxu0 %v5757_v23  ;;  %v5727_v28 = vld [vmem:[#allocation7 + $0x364] ss:$48 sps:$4 sm:$0xff]   ;;  %v5729_v31 = vld [vmem:[#allocation7 + $0x360] ss:$48 sps:$4 sm:$0xff]  }
  0x6b   :  { %1897 = vmatprep.subr.bf16.mxu1 %v5712_v8  ;;  %2093 = vmatprep.mubr.bf16.mxu0 %v6768_v20  ;;  %v5769_v30 = vld [vmem:[#allocation7 + $0x194] ss:$48 sps:$4 sm:$0xff]   ;;  %v5774_v33 = vld [vmem:[#allocation7 + $0x190] ss:$48 sps:$4 sm:$0xff]  }
  0x6c   :  { %v5730_v32 = vld [vmem:[#allocation7 + $0x3c4] ss:$48 sps:$4 sm:$0xff]   ;;  %v5732_v35 = vld [vmem:[#allocation7 + $0x3c0] ss:$48 sps:$4 sm:$0xff]  }
  0x6d   :  { %2066 = vmatpush1.bf16.msra.mxu0 %v5762_v25  ;;  %v5775_v34 = vld [vmem:[#allocation7 + $0x1f4] ss:$48 sps:$4 sm:$0xff]   ;;  %v5780_v37 = vld [vmem:[#allocation7 + $0x1f0] ss:$48 sps:$4 sm:$0xff]  }
  0x6e   :  { %1898 = vmatpush1.bf16.msra.mxu1 %v5714_v9  ;;  %2067 = vmatprep.subr.bf16.mxu0 %v5763_v26  ;;  %v5733_v36 = vld [vmem:[#allocation7 + $0x424] ss:$48 sps:$4 sm:$0xff]   ;;  %v5735_v39 = vld [vmem:[#allocation7 + $0x420] ss:$48 sps:$4 sm:$0xff]  }
  0x6f   :  { %1899 = vmatprep.subr.bf16.mxu1 %v5715_v10  ;;  %v5781_v38 = vld [vmem:[#allocation7 + $0x254] ss:$48 sps:$4 sm:$0xff]   ;;  %v5786_v41 = vld [vmem:[#allocation7 + $0x250] ss:$48 sps:$4 sm:$0xff]  }
  0x70   :  { %v5736_v40 = vld [vmem:[#allocation7 + $0x484] ss:$48 sps:$4 sm:$0xff]   ;;  %v5738_v43 = vld [vmem:[#allocation7 + $0x480] ss:$48 sps:$4 sm:$0xff]  }
  0x71   :  { %2068 = vmatpush1.bf16.msra.mxu0 %v5768_v29  ;;  %v5787_v42 = vld [vmem:[#allocation7 + $0x2b4] ss:$48 sps:$4 sm:$0xff]   ;;  %v5792_v45 = vld [vmem:[#allocation7 + $0x2b0] ss:$48 sps:$4 sm:$0xff]  }
  0x72   :  { %1900 = vmatpush1.bf16.msra.mxu1 %v5717_v11  ;;  %2069 = vmatprep.subr.bf16.mxu0 %v5769_v30  ;;  %v5739_v44 = vld [vmem:[#allocation7 + $0x4e4] ss:$48 sps:$4 sm:$0xff]   ;;  %v5741_v47 = vld [vmem:[#allocation7 + $0x4e0] ss:$48 sps:$4 sm:$0xff]   ;;  %v93_v30 = vld [vmem:[#allocation4 + $0x28] sm:$0xff] }
  0x73   :  { %1901 = vmatprep.subr.bf16.mxu1 %v5718_v12  ;;  %v5793_v46 = vld [vmem:[#allocation7 + $0x314] ss:$48 sps:$4 sm:$0xff]   ;;  %v5798_v49 = vld [vmem:[#allocation7 + $0x310] ss:$48 sps:$4 sm:$0xff]  }
  0x74   :  { %v5742_v48 = vld [vmem:[#allocation7 + $0x544] ss:$48 sps:$4 sm:$0xff]   ;;  %v5744_v51 = vld [vmem:[#allocation7 + $0x540] ss:$48 sps:$4 sm:$0xff]  }
  0x75   :  { %2070 = vmatpush1.bf16.msra.mxu0 %v5774_v33  ;;  %v5799_v50 = vld [vmem:[#allocation7 + $0x374] ss:$48 sps:$4 sm:$0xff]   ;;  %v5804_v53 = vld [vmem:[#allocation7 + $0x370] ss:$48 sps:$4 sm:$0xff]  }
  0x76   :  { %1902 = vmatpush1.bf16.msra.mxu1 %v5720_v14  ;;  %2071 = vmatprep.subr.bf16.mxu0 %v5775_v34  ;;  %v5747_v52 = vld [vmem:[#allocation7 + $0x5a4] ss:$48 sps:$4 sm:$0xff]   ;;  %v5750_v54 = vld [vmem:[#allocation7 + $0x5a0] ss:$48 sps:$4 sm:$0xff]  }
  0x77   :  { %1903 = vmatprep.subr.bf16.mxu1 %v5721_v15  ;;  %v5805_v55 = vld [vmem:[#allocation7 + $0x3d4] ss:$48 sps:$4 sm:$0xff]   ;;  %v5810_v59 = vld [vmem:[#allocation7 + $0x3d0] ss:$48 sps:$4 sm:$0xff]  }
  0x78   :  { %v5755_v56 = vld [vmem:[#allocation7 + $0x604] ss:$48 sps:$4 sm:$0xff]   ;;  %v5753_v62 = vld [vmem:[#allocation7 + $0x600] ss:$48 sps:$4 sm:$0xff]  }
  0x79   :  { %2072 = vmatpush1.bf16.msra.mxu0 %v5780_v37  ;;  %v88_v57 = vld [vmem:[#allocation4] sm:$0xff]  ;;  %v90_v29 = vld [vmem:[#allocation4 + $0x10] sm:$0xff] }
  0x7a   :  { %1904 = vmatpush1.bf16.msra.mxu1 %v5723_v22  ;;  %2073 = vmatprep.subr.bf16.mxu0 %v5781_v38  ;;  %v5811_v60 = vld [vmem:[#allocation7 + $0x434] ss:$48 sps:$4 sm:$0xff]   ;;  %v6772_v61 = vpack.c.bf16 %v91_v58, %v88_v57  ;;  %v5816_v0 = vld [vmem:[#allocation7 + $0x430] ss:$48 sps:$4 sm:$0xff]   ;;  %v6778_v34 = vpack.c.bf16 %v93_v30, %v90_v29  ;;  %v5886_v30 = vld [vmem:[#allocation7 + $0x548] ss:$48 sps:$4 sm:$0xff]  }
  0x7b   :  { %1905 = vmatprep.subr.bf16.mxu1 %v5724_v24  ;;  %v5761_v63 = vld [vmem:[#allocation7 + $0x664] ss:$48 sps:$4 sm:$0xff]   ;;  %v5759_v2 = vld [vmem:[#allocation7 + $0x660] ss:$48 sps:$4 sm:$0xff]  }
  0x7c   :  { %v5817_v1 = vld [vmem:[#allocation7 + $0x494] ss:$48 sps:$4 sm:$0xff]   ;;  %v5822_v5 = vld [vmem:[#allocation7 + $0x490] ss:$48 sps:$4 sm:$0xff]  }
  0x7d   :  { %2074 = vmatpush1.bf16.msra.mxu0 %v5786_v41  ;;  %v5767_v4 = vld [vmem:[#allocation7 + $0x6c4] ss:$48 sps:$4 sm:$0xff]   ;;  %v5765_v7 = vld [vmem:[#allocation7 + $0x6c0] ss:$48 sps:$4 sm:$0xff]  }
  0x7e   :  { %1906 = vmatpush1.bf16.msra.mxu1 %v5726_v27  ;;  %2075 = vmatprep.subr.bf16.mxu0 %v5787_v42  ;;  %v5823_v6 = vld [vmem:[#allocation7 + $0x4f4] ss:$48 sps:$4 sm:$0xff]   ;;  %v5828_v9 = vld [vmem:[#allocation7 + $0x4f0] ss:$48 sps:$4 sm:$0xff]  }
  0x7f   :  { %1907 = vmatprep.subr.bf16.mxu1 %v5727_v28  ;;  %v5773_v8 = vld [vmem:[#allocation7 + $0x724] ss:$48 sps:$4 sm:$0xff]   ;;  %v5771_v11 = vld [vmem:[#allocation7 + $0x720] ss:$48 sps:$4 sm:$0xff]  }
  0x80   :  { %v5829_v10 = vld [vmem:[#allocation7 + $0x554] ss:$48 sps:$4 sm:$0xff]   ;;  %v5834_v13 = vld [vmem:[#allocation7 + $0x550] ss:$48 sps:$4 sm:$0xff]  }
  0x81   :  { %2076 = vmatpush1.bf16.msra.mxu0 %v5792_v45  ;;  %v5779_v12 = vld [vmem:[#allocation7 + $0x784] ss:$48 sps:$4 sm:$0xff]   ;;  %v5777_v15 = vld [vmem:[#allocation7 + $0x780] ss:$48 sps:$4 sm:$0xff]  }
  0x82   :  { %1908 = vmatpush1.bf16.msra.mxu1 %v5729_v31  ;;  %2077 = vmatprep.subr.bf16.mxu0 %v5793_v46  ;;  %v5835_v14 = vld [vmem:[#allocation7 + $0x5b4] ss:$48 sps:$4 sm:$0xff]   ;;  %v5840_v17 = vld [vmem:[#allocation7 + $0x5b0] ss:$48 sps:$4 sm:$0xff]   ;;  %v5803_v31 = vld [vmem:[#allocation7 + $0xc] ss:$48 sps:$4 sm:$0xff]  }
  0x83   :  { %1909 = vmatprep.subr.bf16.mxu1 %v5730_v32  ;;  %v5785_v16 = vld [vmem:[#allocation7 + $0x7e4] ss:$48 sps:$4 sm:$0xff]   ;;  %v5783_v19 = vld [vmem:[#allocation7 + $0x7e0] ss:$48 sps:$4 sm:$0xff]  }
  0x84   :  { %v5843_v18 = vld [vmem:[#allocation7 + $0x614] ss:$48 sps:$4 sm:$0xff]   ;;  %v5841_v22 = vld [vmem:[#allocation7 + $0x610] ss:$48 sps:$4 sm:$0xff]  }
  0x85   :  { %2078 = vmatpush1.bf16.msra.mxu0 %v5798_v49  ;;  %v5791_v21 = vld [vmem:[#allocation7 + $0x844] ss:$48 sps:$4 sm:$0xff]   ;;  %v5789_v24 = vld [vmem:[#allocation7 + $0x840] ss:$48 sps:$4 sm:$0xff]  }
  0x86   :  { %1910 = vmatpush1.bf16.msra.mxu1 %v5732_v35  ;;  %2079 = vmatprep.subr.bf16.mxu0 %v5799_v50  ;;  %v5849_v23 = vld [vmem:[#allocation7 + $0x674] ss:$48 sps:$4 sm:$0xff]   ;;  %v5847_v26 = vld [vmem:[#allocation7 + $0x670] ss:$48 sps:$4 sm:$0xff]   ;;  %v5801_v35 = vld [vmem:[#allocation7 + $0x8] ss:$48 sps:$4 sm:$0xff]  }
  0x87   :  { %1911 = vmatprep.subr.bf16.mxu1 %v5733_v36  ;;  %v5797_v25 = vld [vmem:[#allocation7 + $0x8a4] ss:$48 sps:$4 sm:$0xff]   ;;  %v5795_v27 = vld [vmem:[#allocation7 + $0x8a0] ss:$48 sps:$4 sm:$0xff]   ;;  %v5809_v36 = vld [vmem:[#allocation7 + $0x6c] ss:$48 sps:$4 sm:$0xff]  }
  0x88   :  { %v5855_v28 = vld [vmem:[#allocation7 + $0x6d4] ss:$48 sps:$4 sm:$0xff]   ;;  %v5853_v32 = vld [vmem:[#allocation7 + $0x6d0] ss:$48 sps:$4 sm:$0xff]  }
  0x89   :  { %2080 = vmatpush1.bf16.msra.mxu0 %v5804_v53  ;;  %v5861_v33 = vld [vmem:[#allocation7 + $0x734] ss:$48 sps:$4 sm:$0xff]   ;;  %v5859_v37 = vld [vmem:[#allocation7 + $0x730] ss:$48 sps:$4 sm:$0xff]  }
  0x8a   :  { %1912 = vmatpush1.bf16.msra.mxu1 %v5735_v39  ;;  %2081 = vmatprep.subr.bf16.mxu0 %v5805_v55  ;;  %v5867_v38 = vld [vmem:[#allocation7 + $0x794] ss:$48 sps:$4 sm:$0xff]   ;;  %v5807_v39 = vld [vmem:[#allocation7 + $0x68] ss:$48 sps:$4 sm:$0xff]   ;;  %v5865_v41 = vld [vmem:[#allocation7 + $0x790] ss:$48 sps:$4 sm:$0xff]  }
  0x8b   :  { %1913 = vmatprep.subr.bf16.mxu1 %v5736_v40  ;;  %v5815_v40 = vld [vmem:[#allocation7 + $0xcc] ss:$48 sps:$4 sm:$0xff]   ;;  %v5873_v42 = vld [vmem:[#allocation7 + $0x7f4] ss:$48 sps:$4 sm:$0xff]   ;;  %v5871_v45 = vld [vmem:[#allocation7 + $0x7f0] ss:$48 sps:$4 sm:$0xff]  }
  0x8c   :  { %v5879_v46 = vld [vmem:[#allocation7 + $0x854] ss:$48 sps:$4 sm:$0xff]   ;;  %v5877_v49 = vld [vmem:[#allocation7 + $0x850] ss:$48 sps:$4 sm:$0xff]   ;;  %v5831_v55 = vld [vmem:[#allocation7 + $0x1e8] ss:$48 sps:$4 sm:$0xff]  }
  0x8d   :  { %2082 = vmatpush1.bf16.msra.mxu0 %v5810_v59  ;;  %v5885_v50 = vld [vmem:[#allocation7 + $0x8b4] ss:$48 sps:$4 sm:$0xff]   ;;  %v5883_v53 = vld [vmem:[#allocation7 + $0x8b0] ss:$48 sps:$4 sm:$0xff]   ;;  %v5837_v59 = vld [vmem:[#allocation7 + $0x248] ss:$48 sps:$4 sm:$0xff]  }
  0x8e   :  { %1914 = vmatpush1.bf16.msra.mxu1 %v5738_v43  ;;  %2083 = vmatprep.subr.bf16.mxu0 %v5811_v60  ;;  %v5813_v43 = vld [vmem:[#allocation7 + $0xc8] ss:$48 sps:$4 sm:$0xff]   ;;  %v5889_v57 = vld [vmem:[#allocation7 + $0x20] ss:$48 sps:$4 sm:$0xff]   ;;  %v5897_v58 = vld [vmem:[#allocation7 + $0x84] ss:$48 sps:$4 sm:$0xff]  }
  0x8f   :  { %1915 = vmatprep.subr.bf16.mxu1 %v5739_v44  ;;  %v5821_v44 = vld [vmem:[#allocation7 + $0x12c] ss:$48 sps:$4 sm:$0xff]   ;;  %v5945_v29 = vld [vmem:[#allocation7 + $0x384] ss:$48 sps:$4 sm:$0xff]  }
  0x90   :  { %v5846_v60 = vld [vmem:[#allocation7 + $0x2ac] ss:$48 sps:$4 sm:$0xff]  }
  0x91   :  { %2084 = vmatpush1.bf16.msra.mxu0 %v5816_v0  ;;  %v5844_v0 = vld [vmem:[#allocation7 + $0x2a8] ss:$48 sps:$4 sm:$0xff]  }
  0x92   :  { %1916 = vmatpush1.bf16.msra.mxu1 %v5741_v47  ;;  %2085 = vmatprep.subr.bf16.mxu0 %v5817_v1  ;;  %v5819_v47 = vld [vmem:[#allocation7 + $0x128] ss:$48 sps:$4 sm:$0xff]   ;;  %v5852_v1 = vld [vmem:[#allocation7 + $0x30c] ss:$48 sps:$4 sm:$0xff]  }
  0x93   :  { %1917 = vmatprep.subr.bf16.mxu1 %v5742_v48  ;;  %v5827_v48 = vld [vmem:[#allocation7 + $0x18c] ss:$48 sps:$4 sm:$0xff]  }
  0x95   :  { %2086 = vmatpush1.bf16.msra.mxu0 %v5822_v5  ;;  %v5850_v5 = vld [vmem:[#allocation7 + $0x308] ss:$48 sps:$4 sm:$0xff]  }
  0x96   :  { %1918 = vmatpush1.bf16.msra.mxu1 %v5744_v51  ;;  %2087 = vmatprep.subr.bf16.mxu0 %v5823_v6  ;;  %v5825_v51 = vld [vmem:[#allocation7 + $0x188] ss:$48 sps:$4 sm:$0xff]   ;;  %v5858_v6 = vld [vmem:[#allocation7 + $0x36c] ss:$48 sps:$4 sm:$0xff]  }
  0x97   :  { %1919 = vmatprep.subr.bf16.mxu1 %v5747_v52  ;;  %v5833_v52 = vld [vmem:[#allocation7 + $0x1ec] ss:$48 sps:$4 sm:$0xff]  }
  0x99   :  { %2088 = vmatpush1.bf16.msra.mxu0 %v5828_v9  ;;  %v5856_v9 = vld [vmem:[#allocation7 + $0x368] ss:$48 sps:$4 sm:$0xff]  }
  0x9a   :  { %1920 = vmatpush1.bf16.msra.mxu1 %v5750_v54  ;;  %2089 = vmatprep.subr.bf16.mxu0 %v5829_v10  ;;  %v5891_v54 = vld [vmem:[#allocation7 + $0x24] ss:$48 sps:$4 sm:$0xff]   ;;  %v5864_v10 = vld [vmem:[#allocation7 + $0x3cc] ss:$48 sps:$4 sm:$0xff]  }
  0x9b   :  { %1932 = vmatprep.subr.bf16.mxu1 %v5755_v56  ;;  %v5839_v56 = vld [vmem:[#allocation7 + $0x24c] ss:$48 sps:$4 sm:$0xff]  }
  0x9d   :  { %1922 = vmatmul.mubr.bf16.vlgmr.msra.gmra.mrb[0].mxu1 %v6772_v61  ;;  %2090 = vmatpush1.bf16.msra.mxu0 %v5834_v13  ;;  %v5862_v13 = vld [vmem:[#allocation7 + $0x3c8] ss:$48 sps:$4 sm:$0xff]  }
  0x9e   :  { %1933 = vmatpush1.bf16.msra.mxu1 %v5753_v62  ;;  %1964 = vmatprep.mubr.bf16.mxu1 %v6668_v3  ;;  %v5895_v62 = vld [vmem:[#allocation7 + $0x80] ss:$48 sps:$4 sm:$0xff]  }
  0x9f   :  { %1934 = vmatprep.subr.bf16.mxu1 %v5761_v63  ;;  %2091 = vmatprep.subr.bf16.mxu0 %v5835_v14  ;;  %v5903_v63 = vld [vmem:[#allocation7 + $0xe4] ss:$48 sps:$4 sm:$0xff]   ;;  %v5870_v14 = vld [vmem:[#allocation7 + $0x42c] ss:$48 sps:$4 sm:$0xff]  }
  0xa1   :  { %2092 = vmatpush1.bf16.msra.mxu0 %v5840_v17  ;;  %v5868_v17 = vld [vmem:[#allocation7 + $0x428] ss:$48 sps:$4 sm:$0xff]  }
  0xa2   :  { %1935 = vmatpush1.bf16.msra.mxu1 %v5759_v2  ;;  %2104 = vmatprep.subr.bf16.mxu0 %v5843_v18  ;;  %v5901_v2 = vld [vmem:[#allocation7 + $0xe0] ss:$48 sps:$4 sm:$0xff]   ;;  %v5876_v18 = vld [vmem:[#allocation7 + $0x48c] ss:$48 sps:$4 sm:$0xff]  }
  0xa3   :  { %1936 = vmatprep.subr.bf16.mxu1 %v5767_v4  ;;  %v5909_v4 = vld [vmem:[#allocation7 + $0x144] ss:$48 sps:$4 sm:$0xff]  }
  0xa4   :  { %2094 = vmatmul.mubr.bf16.vlgmr.msra.gmra.mrb[0].mxu0 %v6772_v61 }
  0xa5   :  { %2105 = vmatpush1.bf16.msra.mxu0 %v5841_v22  ;;  %2136 = vmatprep.mubr.bf16.mxu0 %v6668_v3  ;;  %v5874_v22 = vld [vmem:[#allocation7 + $0x488] ss:$48 sps:$4 sm:$0xff]  }
  0xa6   :  { %1937 = vmatpush1.bf16.msra.mxu1 %v5765_v7  ;;  %2106 = vmatprep.subr.bf16.mxu0 %v5849_v23  ;;  %v5907_v7 = vld [vmem:[#allocation7 + $0x140] ss:$48 sps:$4 sm:$0xff]   ;;  %v5882_v23 = vld [vmem:[#allocation7 + $0x4ec] ss:$48 sps:$4 sm:$0xff]  }
  0xa7   :  { %1938 = vmatprep.subr.bf16.mxu1 %v5773_v8  ;;  %v5915_v8 = vld [vmem:[#allocation7 + $0x1a4] ss:$48 sps:$4 sm:$0xff]  }
  0xa9   :  { %2107 = vmatpush1.bf16.msra.mxu0 %v5847_v26  ;;  %v5880_v26 = vld [vmem:[#allocation7 + $0x4e8] ss:$48 sps:$4 sm:$0xff]  }
  0xaa   :  { %1939 = vmatpush1.bf16.msra.mxu1 %v5771_v11  ;;  %2108 = vmatprep.subr.bf16.mxu0 %v5855_v28  ;;  %v5913_v11 = vld [vmem:[#allocation7 + $0x1a0] ss:$48 sps:$4 sm:$0xff]  }
  0xab   :  { %1940 = vmatprep.subr.bf16.mxu1 %v5779_v12  ;;  %v5921_v12 = vld [vmem:[#allocation7 + $0x204] ss:$48 sps:$4 sm:$0xff]   ;;  %v5937_v28 = vld [vmem:[#allocation7 + $0x320] ss:$48 sps:$4 sm:$0xff]  }
  0xad   :  { %2109 = vmatpush1.bf16.msra.mxu0 %v5853_v32  ;;  %v5943_v32 = vld [vmem:[#allocation7 + $0x380] ss:$48 sps:$4 sm:$0xff]  }
  0xae   :  { %1941 = vmatpush1.bf16.msra.mxu1 %v5777_v15  ;;  %2110 = vmatprep.subr.bf16.mxu0 %v5861_v33  ;;  %v5919_v15 = vld [vmem:[#allocation7 + $0x200] ss:$48 sps:$4 sm:$0xff]   ;;  %v5951_v33 = vld [vmem:[#allocation7 + $0x3e4] ss:$48 sps:$4 sm:$0xff]  }
  0xaf   :  { %1942 = vmatprep.subr.bf16.mxu1 %v5785_v16  ;;  %v5927_v16 = vld [vmem:[#allocation7 + $0x264] ss:$48 sps:$4 sm:$0xff]  }
  0xb1   :  { %2111 = vmatpush1.bf16.msra.mxu0 %v5859_v37  ;;  %v5949_v37 = vld [vmem:[#allocation7 + $0x3e0] ss:$48 sps:$4 sm:$0xff]  }
  0xb2   :  { %1943 = vmatpush1.bf16.msra.mxu1 %v5783_v19  ;;  %2112 = vmatprep.subr.bf16.mxu0 %v5867_v38  ;;  %v5925_v19 = vld [vmem:[#allocation7 + $0x260] ss:$48 sps:$4 sm:$0xff]   ;;  %v5957_v38 = vld [vmem:[#allocation7 + $0x444] ss:$48 sps:$4 sm:$0xff]  }
  0xb3   :  { %1944 = vmatprep.subr.bf16.mxu1 %v5791_v21  ;;  %v5933_v21 = vld [vmem:[#allocation7 + $0x2c4] ss:$48 sps:$4 sm:$0xff]  }
  0xb5   :  { %2113 = vmatpush1.bf16.msra.mxu0 %v5865_v41  ;;  %v5955_v41 = vld [vmem:[#allocation7 + $0x440] ss:$48 sps:$4 sm:$0xff]  }
  0xb6   :  { %1945 = vmatpush1.bf16.msra.mxu1 %v5789_v24  ;;  %2114 = vmatprep.subr.bf16.mxu0 %v5873_v42  ;;  %v5931_v24 = vld [vmem:[#allocation7 + $0x2c0] ss:$48 sps:$4 sm:$0xff]   ;;  %v5963_v42 = vld [vmem:[#allocation7 + $0x4a4] ss:$48 sps:$4 sm:$0xff]  }
  0xb7   :  { %1946 = vmatprep.subr.bf16.mxu1 %v5797_v25  ;;  %v5939_v25 = vld [vmem:[#allocation7 + $0x324] ss:$48 sps:$4 sm:$0xff]  }
  0xb9   :  { %2115 = vmatpush1.bf16.msra.mxu0 %v5871_v45  ;;  %v5961_v45 = vld [vmem:[#allocation7 + $0x4a0] ss:$48 sps:$4 sm:$0xff]  }
  0xba   :  { %1947 = vmatpush1.bf16.msra.mxu1 %v5795_v27  ;;  %2116 = vmatprep.subr.bf16.mxu0 %v5879_v46  ;;  %v5888_v27 = vld [vmem:[#allocation7 + $0x54c] ss:$48 sps:$4 sm:$0xff]   ;;  %v5969_v46 = vld [vmem:[#allocation7 + $0x504] ss:$48 sps:$4 sm:$0xff]  }
  0xbb   :  { %1975 = vmatprep.subr.bf16.mxu1 %v5803_v31  ;;  %v5894_v31 = vld [vmem:[#allocation7 + $0x5ac] ss:$48 sps:$4 sm:$0xff]  }
  0xbd   :  { %1965 = vmatmul.mubr.bf16.vlgmr.msra.gmra.mrb[0].mxu1 %v6778_v34  ;;  %2117 = vmatpush1.bf16.msra.mxu0 %v5877_v49  ;;  %v5967_v49 = vld [vmem:[#allocation7 + $0x500] ss:$48 sps:$4 sm:$0xff]  }
  0xbe   :  { %1976 = vmatpush1.bf16.msra.mxu1 %v5801_v35  ;;  %2007 = vmatprep.mubr.bf16.mxu1 %v6768_v20  ;;  %v5892_v35 = vld [vmem:[#allocation7 + $0x5a8] ss:$48 sps:$4 sm:$0xff]  }
  0xbf   :  { %1977 = vmatprep.subr.bf16.mxu1 %v5809_v36  ;;  %2118 = vmatprep.subr.bf16.mxu0 %v5885_v50  ;;  %v5900_v36 = vld [vmem:[#allocation7 + $0x60c] ss:$48 sps:$4 sm:$0xff]   ;;  %v5975_v50 = vld [vmem:[#allocation7 + $0x564] ss:$48 sps:$4 sm:$0xff]  }
  0xc1   :  { %2119 = vmatpush1.bf16.msra.mxu0 %v5883_v53  ;;  %v5973_v53 = vld [vmem:[#allocation7 + $0x560] ss:$48 sps:$4 sm:$0xff]  }
  0xc2   :  { %1978 = vmatpush1.bf16.msra.mxu1 %v5807_v39  ;;  %2233 = vmatprep.subr.bf16.mxu0 %v5891_v54  ;;  %v5898_v39 = vld [vmem:[#allocation7 + $0x608] ss:$48 sps:$4 sm:$0xff]   ;;  %v5981_v54 = vld [vmem:[#allocation7 + $0x5c4] ss:$48 sps:$4 sm:$0xff]  }
  0xc3   :  { %1979 = vmatprep.subr.bf16.mxu1 %v5815_v40  ;;  %v5906_v40 = vld [vmem:[#allocation7 + $0x66c] ss:$48 sps:$4 sm:$0xff]  }
  0xc4   :  { %2137 = vmatmul.mubr.bf16.vlgmr.msra.gmra.mrb[0].mxu0 %v6778_v34 }
  0xc5   :  { %2234 = vmatpush1.bf16.msra.mxu0 %v5889_v57  ;;  %2265 = vmatprep.mubr.bf16.mxu0 %v6768_v20  ;;  %v5979_v57 = vld [vmem:[#allocation7 + $0x5c0] ss:$48 sps:$4 sm:$0xff]  }
  0xc6   :  { %1980 = vmatpush1.bf16.msra.mxu1 %v5813_v43  ;;  %2235 = vmatprep.subr.bf16.mxu0 %v5897_v58  ;;  %v5904_v43 = vld [vmem:[#allocation7 + $0x668] ss:$48 sps:$4 sm:$0xff]   ;;  %v5987_v58 = vld [vmem:[#allocation7 + $0x624] ss:$48 sps:$4 sm:$0xff]  }
  0xc7   :  { %1981 = vmatprep.subr.bf16.mxu1 %v5821_v44  ;;  %v5912_v44 = vld [vmem:[#allocation7 + $0x6cc] ss:$48 sps:$4 sm:$0xff]  }
  0xc9   :  { %2236 = vmatpush1.bf16.msra.mxu0 %v5895_v62  ;;  %v5985_v62 = vld [vmem:[#allocation7 + $0x620] ss:$48 sps:$4 sm:$0xff]  }
  0xca   :  { %1982 = vmatpush1.bf16.msra.mxu1 %v5819_v47  ;;  %2237 = vmatprep.subr.bf16.mxu0 %v5903_v63  ;;  %v5910_v47 = vld [vmem:[#allocation7 + $0x6c8] ss:$48 sps:$4 sm:$0xff]   ;;  %v5993_v63 = vld [vmem:[#allocation7 + $0x684] ss:$48 sps:$4 sm:$0xff]  }
  0xcb   :  { %1983 = vmatprep.subr.bf16.mxu1 %v5827_v48  ;;  %v5918_v48 = vld [vmem:[#allocation7 + $0x72c] ss:$48 sps:$4 sm:$0xff]  }
  0xcd   :  { %2238 = vmatpush1.bf16.msra.mxu0 %v5901_v2  ;;  %v5991_v2 = vld [vmem:[#allocation7 + $0x680] ss:$48 sps:$4 sm:$0xff]  }
  0xce   :  { %1984 = vmatpush1.bf16.msra.mxu1 %v5825_v51  ;;  %2239 = vmatprep.subr.bf16.mxu0 %v5909_v4  ;;  %v5916_v51 = vld [vmem:[#allocation7 + $0x728] ss:$48 sps:$4 sm:$0xff]   ;;  %v5999_v4 = vld [vmem:[#allocation7 + $0x6e4] ss:$48 sps:$4 sm:$0xff]  }
  0xcf   :  { %1985 = vmatprep.subr.bf16.mxu1 %v5833_v52  ;;  %v5924_v52 = vld [vmem:[#allocation7 + $0x78c] ss:$48 sps:$4 sm:$0xff]  }
  0xd1   :  { %2240 = vmatpush1.bf16.msra.mxu0 %v5907_v7  ;;  %v5997_v7 = vld [vmem:[#allocation7 + $0x6e0] ss:$48 sps:$4 sm:$0xff]  }
  0xd2   :  { %1986 = vmatpush1.bf16.msra.mxu1 %v5831_v55  ;;  %2241 = vmatprep.subr.bf16.mxu0 %v5915_v8  ;;  %v5922_v55 = vld [vmem:[#allocation7 + $0x788] ss:$48 sps:$4 sm:$0xff]   ;;  %v6005_v8 = vld [vmem:[#allocation7 + $0x744] ss:$48 sps:$4 sm:$0xff]  }
  0xd3   :  { %1987 = vmatprep.subr.bf16.mxu1 %v5839_v56  ;;  %v5930_v56 = vld [vmem:[#allocation7 + $0x7ec] ss:$48 sps:$4 sm:$0xff]  }
  0xd5   :  { %2242 = vmatpush1.bf16.msra.mxu0 %v5913_v11  ;;  %v6003_v11 = vld [vmem:[#allocation7 + $0x740] ss:$48 sps:$4 sm:$0xff]  }
  0xd6   :  { %1988 = vmatpush1.bf16.msra.mxu1 %v5837_v59  ;;  %2243 = vmatprep.subr.bf16.mxu0 %v5921_v12  ;;  %v5928_v59 = vld [vmem:[#allocation7 + $0x7e8] ss:$48 sps:$4 sm:$0xff]   ;;  %v6011_v12 = vld [vmem:[#allocation7 + $0x7a4] ss:$48 sps:$4 sm:$0xff]  }
  0xd7   :  { %1989 = vmatprep.subr.bf16.mxu1 %v5846_v60  ;;  %v5936_v60 = vld [vmem:[#allocation7 + $0x84c] ss:$48 sps:$4 sm:$0xff]  }
  0xd9   :  { %2244 = vmatpush1.bf16.msra.mxu0 %v5919_v15  ;;  %v6009_v15 = vld [vmem:[#allocation7 + $0x7a0] ss:$48 sps:$4 sm:$0xff]  }
  0xda   :  { %1990 = vmatpush1.bf16.msra.mxu1 %v5844_v0  ;;  %2245 = vmatprep.subr.bf16.mxu0 %v5927_v16  ;;  %v5934_v0 = vld [vmem:[#allocation7 + $0x848] ss:$48 sps:$4 sm:$0xff]   ;;  %v6017_v16 = vld [vmem:[#allocation7 + $0x804] ss:$48 sps:$4 sm:$0xff]  }
  0xdb   :  { %1991 = vmatprep.subr.bf16.mxu1 %v5852_v1  ;;  %v5942_v1 = vld [vmem:[#allocation7 + $0x8ac] ss:$48 sps:$4 sm:$0xff]  }
  0xdd   :  { %2246 = vmatpush1.bf16.msra.mxu0 %v5925_v19  ;;  %v6015_v19 = vld [vmem:[#allocation7 + $0x800] ss:$48 sps:$4 sm:$0xff]  }
  0xde   :  { %1992 = vmatpush1.bf16.msra.mxu1 %v5850_v5  ;;  %2247 = vmatprep.subr.bf16.mxu0 %v5933_v21  ;;  %v5940_v5 = vld [vmem:[#allocation7 + $0x8a8] ss:$48 sps:$4 sm:$0xff]   ;;  %v6023_v21 = vld [vmem:[#allocation7 + $0x864] ss:$48 sps:$4 sm:$0xff]  }
  0xdf   :  { %1993 = vmatprep.subr.bf16.mxu1 %v5858_v6  ;;  %v5948_v6 = vld [vmem:[#allocation7 + $0x1c] ss:$48 sps:$4 sm:$0xff]  }
  0xe1   :  { %2248 = vmatpush1.bf16.msra.mxu0 %v5931_v24  ;;  %v6021_v24 = vld [vmem:[#allocation7 + $0x860] ss:$48 sps:$4 sm:$0xff]  }
  0xe2   :  { %1994 = vmatpush1.bf16.msra.mxu1 %v5856_v9  ;;  %2249 = vmatprep.subr.bf16.mxu0 %v5939_v25  ;;  %v5946_v9 = vld [vmem:[#allocation7 + $0x18] ss:$48 sps:$4 sm:$0xff]   ;;  %v6029_v25 = vld [vmem:[#allocation7 + $0x8c4] ss:$48 sps:$4 sm:$0xff]  }
  0xe3   :  { %1995 = vmatprep.subr.bf16.mxu1 %v5864_v10  ;;  %v5954_v10 = vld [vmem:[#allocation7 + $0x7c] ss:$48 sps:$4 sm:$0xff]  }
  0xe5   :  { %2250 = vmatpush1.bf16.msra.mxu0 %v5937_v28  ;;  %v6027_v28 = vld [vmem:[#allocation7 + $0x8c0] ss:$48 sps:$4 sm:$0xff]  }
  0xe6   :  { %1996 = vmatpush1.bf16.msra.mxu1 %v5862_v13  ;;  %2251 = vmatprep.subr.bf16.mxu0 %v5945_v29  ;;  %v5952_v13 = vld [vmem:[#allocation7 + $0x78] ss:$48 sps:$4 sm:$0xff]   ;;  %v6038_v29 = vld [vmem:[#allocation10 + $0x4] ss:$12 sps:$4 sm:$0xff]  }
  0xe7   :  { %1997 = vmatprep.subr.bf16.mxu1 %v5870_v14  ;;  %v5960_v14 = vld [vmem:[#allocation7 + $0xdc] ss:$48 sps:$4 sm:$0xff]  }
  0xe9   :  { %2252 = vmatpush1.bf16.msra.mxu0 %v5943_v32  ;;  %v6036_v32 = vld [vmem:[#allocation10] ss:$12 sps:$4 sm:$0xff]  }
  0xea   :  { %1998 = vmatpush1.bf16.msra.mxu1 %v5868_v17  ;;  %2253 = vmatprep.subr.bf16.mxu0 %v5951_v33  ;;  %v5958_v17 = vld [vmem:[#allocation7 + $0xd8] ss:$48 sps:$4 sm:$0xff]  }
  0xeb   :  { %1999 = vmatprep.subr.bf16.mxu1 %v5876_v18  ;;  %v5966_v18 = vld [vmem:[#allocation7 + $0x13c] ss:$48 sps:$4 sm:$0xff]   ;;  %v6044_v33 = vld [vmem:[#allocation10 + $0x1c] ss:$12 sps:$4 sm:$0xff]  }
  0xed   :  { %2254 = vmatpush1.bf16.msra.mxu0 %v5949_v37  ;;  %v6042_v37 = vld [vmem:[#allocation10 + $0x18] ss:$12 sps:$4 sm:$0xff]  }
  0xee   :  { %2000 = vmatpush1.bf16.msra.mxu1 %v5874_v22  ;;  %2255 = vmatprep.subr.bf16.mxu0 %v5957_v38  ;;  %v5964_v22 = vld [vmem:[#allocation7 + $0x138] ss:$48 sps:$4 sm:$0xff]   ;;  %v6050_v38 = vld [vmem:[#allocation10 + $0x34] ss:$12 sps:$4 sm:$0xff]  }
  0xef   :  { %2001 = vmatprep.subr.bf16.mxu1 %v5882_v23  ;;  %v5972_v23 = vld [vmem:[#allocation7 + $0x19c] ss:$48 sps:$4 sm:$0xff]  }
  0xf1   :  { %2256 = vmatpush1.bf16.msra.mxu0 %v5955_v41  ;;  %v6048_v41 = vld [vmem:[#allocation10 + $0x30] ss:$12 sps:$4 sm:$0xff]  }
  0xf2   :  { %2002 = vmatpush1.bf16.msra.mxu1 %v5880_v26  ;;  %2257 = vmatprep.subr.bf16.mxu0 %v5963_v42  ;;  %v5970_v26 = vld [vmem:[#allocation7 + $0x198] ss:$48 sps:$4 sm:$0xff]  }
  0xf3   :  { %2003 = vmatprep.subr.bf16.mxu1 %v5888_v27  ;;  %v5978_v27 = vld [vmem:[#allocation7 + $0x1fc] ss:$48 sps:$4 sm:$0xff]   ;;  %v6056_v42 = vld [vmem:[#allocation10 + $0x4c] ss:$12 sps:$4 sm:$0xff]  }
  0xf5   :  { %2258 = vmatpush1.bf16.msra.mxu0 %v5961_v45  ;;  %v6054_v45 = vld [vmem:[#allocation10 + $0x48] ss:$12 sps:$4 sm:$0xff]  }
  0xf6   :  { %2004 = vmatpush1.bf16.msra.mxu1 %v5886_v30  ;;  %2259 = vmatprep.subr.bf16.mxu0 %v5969_v46  ;;  %v5976_v30 = vld [vmem:[#allocation7 + $0x1f8] ss:$48 sps:$4 sm:$0xff]   ;;  %v6062_v46 = vld [vmem:[#allocation10 + $0x64] ss:$12 sps:$4 sm:$0xff]  }
  0xf7   :  { %2005 = vmatprep.subr.bf16.mxu1 %v5894_v31  ;;  %v5984_v31 = vld [vmem:[#allocation7 + $0x25c] ss:$48 sps:$4 sm:$0xff]  }
  0xf9   :  { %2260 = vmatpush1.bf16.msra.mxu0 %v5967_v49  ;;  %v6060_v49 = vld [vmem:[#allocation10 + $0x60] ss:$12 sps:$4 sm:$0xff]  }
  0xfa   :  { %2006 = vmatpush1.bf16.msra.mxu1 %v5892_v35  ;;  %2261 = vmatprep.subr.bf16.mxu0 %v5975_v50  ;;  %v5982_v35 = vld [vmem:[#allocation7 + $0x258] ss:$48 sps:$4 sm:$0xff]  }
  0xfb   :  { %2018 = vmatprep.subr.bf16.mxu1 %v5900_v36  ;;  %v5990_v36 = vld [vmem:[#allocation7 + $0x2bc] ss:$48 sps:$4 sm:$0xff]   ;;  %v6068_v50 = vld [vmem:[#allocation10 + $0x7c] ss:$12 sps:$4 sm:$0xff]  }
  0xfd   :  { %2008 = vmatmul.mubr.bf16.vlgmr.msra.gmra.mrb[4].mxu1 %v6772_v61  ;;  %2262 = vmatpush1.bf16.msra.mxu0 %v5973_v53  ;;  %v6066_v53 = vld [vmem:[#allocation10 + $0x78] ss:$12 sps:$4 sm:$0xff]  }
  0xfe   :  { %2019 = vmatpush1.bf16.msra.mxu1 %v5898_v39  ;;  %2050 = vmatprep.mubr.bf16.mxu1 %v6668_v3  ;;  %v5988_v39 = vld [vmem:[#allocation7 + $0x2b8] ss:$48 sps:$4 sm:$0xff]  }
  0xff   :  { %2020 = vmatprep.subr.bf16.mxu1 %v5906_v40  ;;  %2263 = vmatprep.subr.bf16.mxu0 %v5981_v54  ;;  %v5996_v40 = vld [vmem:[#allocation7 + $0x31c] ss:$48 sps:$4 sm:$0xff]  }
 0x100   :  { %v6074_v54 = vld [vmem:[#allocation10 + $0x94] ss:$12 sps:$4 sm:$0xff]  }
 0x101   :  { %2264 = vmatpush1.bf16.msra.mxu0 %v5979_v57  ;;  %v6072_v57 = vld [vmem:[#allocation10 + $0x90] ss:$12 sps:$4 sm:$0xff]  }
 0x102   :  { %2021 = vmatpush1.bf16.msra.mxu1 %v5904_v43  ;;  %2276 = vmatprep.subr.bf16.mxu0 %v5987_v58  ;;  %v5994_v43 = vld [vmem:[#allocation7 + $0x318] ss:$48 sps:$4 sm:$0xff]  }
 0x103   :  { %2022 = vmatprep.subr.bf16.mxu1 %v5912_v44  ;;  %v6002_v44 = vld [vmem:[#allocation7 + $0x37c] ss:$48 sps:$4 sm:$0xff]   ;;  %v6080_v58 = vld [vmem:[#allocation10 + $0xac] ss:$12 sps:$4 sm:$0xff]  }
 0x104   :  { %2266 = vmatmul.mubr.bf16.vlgmr.msra.gmra.mrb[4].mxu0 %v6772_v61 }
 0x105   :  { %2277 = vmatpush1.bf16.msra.mxu0 %v5985_v62  ;;  %2308 = vmatprep.mubr.bf16.mxu0 %v6668_v3  ;;  %v6078_v62 = vld [vmem:[#allocation10 + $0xa8] ss:$12 sps:$4 sm:$0xff]  }
 0x106   :  { %2023 = vmatpush1.bf16.msra.mxu1 %v5910_v47  ;;  %2278 = vmatprep.subr.bf16.mxu0 %v5993_v63  ;;  %v6000_v47 = vld [vmem:[#allocation7 + $0x378] ss:$48 sps:$4 sm:$0xff]   ;;  %v6086_v63 = vld [vmem:[#allocation10 + $0xc4] ss:$12 sps:$4 sm:$0xff]  }
 0x107   :  { %2024 = vmatprep.subr.bf16.mxu1 %v5918_v48  ;;  %v6008_v48 = vld [vmem:[#allocation7 + $0x3dc] ss:$48 sps:$4 sm:$0xff]  }
 0x109   :  { %2279 = vmatpush1.bf16.msra.mxu0 %v5991_v2  ;;  %v6084_v2 = vld [vmem:[#allocation10 + $0xc0] ss:$12 sps:$4 sm:$0xff]  }
 0x10a   :  { %2025 = vmatpush1.bf16.msra.mxu1 %v5916_v51  ;;  %2280 = vmatprep.subr.bf16.mxu0 %v5999_v4  ;;  %v6006_v51 = vld [vmem:[#allocation7 + $0x3d8] ss:$48 sps:$4 sm:$0xff]  }
 0x10b   :  { %2026 = vmatprep.subr.bf16.mxu1 %v5924_v52  ;;  %v6014_v52 = vld [vmem:[#allocation7 + $0x43c] ss:$48 sps:$4 sm:$0xff]   ;;  %v6092_v4 = vld [vmem:[#allocation10 + $0xdc] ss:$12 sps:$4 sm:$0xff]  }
 0x10d   :  { %2281 = vmatpush1.bf16.msra.mxu0 %v5997_v7  ;;  %v6090_v7 = vld [vmem:[#allocation10 + $0xd8] ss:$12 sps:$4 sm:$0xff]  }
 0x10e   :  { %2027 = vmatpush1.bf16.msra.mxu1 %v5922_v55  ;;  %2282 = vmatprep.subr.bf16.mxu0 %v6005_v8  ;;  %v6012_v55 = vld [vmem:[#allocation7 + $0x438] ss:$48 sps:$4 sm:$0xff]   ;;  %v6098_v8 = vld [vmem:[#allocation10 + $0xf4] ss:$12 sps:$4 sm:$0xff]  }
 0x10f   :  { %2028 = vmatprep.subr.bf16.mxu1 %v5930_v56  ;;  %v6020_v56 = vld [vmem:[#allocation7 + $0x49c] ss:$48 sps:$4 sm:$0xff]  }
 0x111   :  { %2283 = vmatpush1.bf16.msra.mxu0 %v6003_v11  ;;  %v6096_v11 = vld [vmem:[#allocation10 + $0xf0] ss:$12 sps:$4 sm:$0xff]  }
 0x112   :  { %2029 = vmatpush1.bf16.msra.mxu1 %v5928_v59  ;;  %2284 = vmatprep.subr.bf16.mxu0 %v6011_v12  ;;  %v6018_v59 = vld [vmem:[#allocation7 + $0x498] ss:$48 sps:$4 sm:$0xff]  }
 0x113   :  { %2030 = vmatprep.subr.bf16.mxu1 %v5936_v60  ;;  %v6026_v60 = vld [vmem:[#allocation7 + $0x4fc] ss:$48 sps:$4 sm:$0xff]   ;;  %v6039_v12 = vld [vmem:[#allocation7 + $0x618] ss:$48 sps:$4 sm:$0xff]  }
 0x115   :  { %2285 = vmatpush1.bf16.msra.mxu0 %v6009_v15  ;;  %v6102_v15 = vld [vmem:[#allocation10 + $0x108] ss:$12 sps:$4 sm:$0xff]  }
 0x116   :  { %2031 = vmatpush1.bf16.msra.mxu1 %v5934_v0  ;;  %2286 = vmatprep.subr.bf16.mxu0 %v6017_v16  ;;  %v6024_v0 = vld [vmem:[#allocation7 + $0x4f8] ss:$48 sps:$4 sm:$0xff]   ;;  %v6110_v16 = vld [vmem:[#allocation10 + $0x124] ss:$12 sps:$4 sm:$0xff]  }
 0x117   :  { %2032 = vmatprep.subr.bf16.mxu1 %v5942_v1  ;;  %v6032_v1 = vld [vmem:[#allocation7 + $0x55c] ss:$48 sps:$4 sm:$0xff]  }
 0x119   :  { %2287 = vmatpush1.bf16.msra.mxu0 %v6015_v19  ;;  %v6108_v19 = vld [vmem:[#allocation10 + $0x120] ss:$12 sps:$4 sm:$0xff]  }
 0x11a   :  { %2033 = vmatpush1.bf16.msra.mxu1 %v5940_v5  ;;  %2288 = vmatprep.subr.bf16.mxu0 %v6023_v21  ;;  %v6030_v5 = vld [vmem:[#allocation7 + $0x558] ss:$48 sps:$4 sm:$0xff]  }
 0x11b   :  { %2147 = vmatprep.subr.bf16.mxu1 %v5948_v6  ;;  %v6035_v6 = vld [vmem:[#allocation7 + $0x5bc] ss:$48 sps:$4 sm:$0xff]   ;;  %v6116_v21 = vld [vmem:[#allocation10 + $0x13c] ss:$12 sps:$4 sm:$0xff]  }
 0x11d   :  { %2051 = vmatmul.mubr.bf16.vlgmr.msra.gmra.mrb[4].mxu1 %v6778_v34  ;;  %2289 = vmatpush1.bf16.msra.mxu0 %v6021_v24  ;;  %v6114_v24 = vld [vmem:[#allocation10 + $0x138] ss:$12 sps:$4 sm:$0xff]  }
 0x11e   :  { %2148 = vmatpush1.bf16.msra.mxu1 %v5946_v9  ;;  %2179 = vmatprep.mubr.bf16.mxu1 %v6768_v20  ;;  %v6033_v9 = vld [vmem:[#allocation7 + $0x5b8] ss:$48 sps:$4 sm:$0xff]  }
 0x11f   :  { %2149 = vmatprep.subr.bf16.mxu1 %v5954_v10  ;;  %2290 = vmatprep.subr.bf16.mxu0 %v6029_v25  ;;  %v6041_v10 = vld [vmem:[#allocation7 + $0x61c] ss:$48 sps:$4 sm:$0xff]  }
 0x120   :  { %v6122_v25 = vld [vmem:[#allocation10 + $0x154] ss:$12 sps:$4 sm:$0xff]  }
 0x121   :  { %2291 = vmatpush1.bf16.msra.mxu0 %v6027_v28  ;;  %v6120_v28 = vld [vmem:[#allocation10 + $0x150] ss:$12 sps:$4 sm:$0xff]  }
 0x122   :  { %2150 = vmatpush1.bf16.msra.mxu1 %v5952_v13  ;;  %4378 = vmatprep.subr.bf16.mxu0 %v6038_v29  ;;  %v6104_v13 = vld [vmem:[#allocation10 + $0x10c] ss:$12 sps:$4 sm:$0xff]  }
 0x123   :  { %2151 = vmatprep.subr.bf16.mxu1 %v5960_v14  ;;  %v6047_v14 = vld [vmem:[#allocation7 + $0x67c] ss:$48 sps:$4 sm:$0xff]   ;;  %v6128_v29 = vld [vmem:[#allocation10 + $0x16c] ss:$12 sps:$4 sm:$0xff]  }
 0x124   :  { %2309 = vmatmul.mubr.bf16.vlgmr.msra.gmra.mrb[4].mxu0 %v6778_v34 }
 0x125   :  { %4379 = vmatpush1.bf16.msra.mxu0 %v6036_v32  ;;  %v6126_v32 = vld [vmem:[#allocation10 + $0x168] ss:$12 sps:$4 sm:$0xff]  }
 0x126   :  { %2152 = vmatpush1.bf16.msra.mxu1 %v5958_v17  ;;  %4380 = vmatprep.subr.bf16.mxu0 %v6044_v33  ;;  %v6045_v17 = vld [vmem:[#allocation7 + $0x678] ss:$48 sps:$4 sm:$0xff]   ;;  %v6158_v33 = vld [vmem:[#allocation10 + $0x184] ss:$12 sps:$4 sm:$0xff]  }
 0x127   :  { %2153 = vmatprep.subr.bf16.mxu1 %v5966_v18  ;;  %v6053_v18 = vld [vmem:[#allocation7 + $0x6dc] ss:$48 sps:$4 sm:$0xff]  }
 0x129   :  { %4381 = vmatpush1.bf16.msra.mxu0 %v6042_v37  ;;  %v6075_v37 = vld [vmem:[#allocation7 + $0x858] ss:$48 sps:$4 sm:$0xff]  }
 0x12a   :  { %2154 = vmatpush1.bf16.msra.mxu1 %v5964_v22  ;;  %4382 = vmatprep.subr.bf16.mxu0 %v6050_v38  ;;  %v6051_v22 = vld [vmem:[#allocation7 + $0x6d8] ss:$48 sps:$4 sm:$0xff]   ;;  %v6083_v38 = vld [vmem:[#allocation7 + $0x8bc] ss:$48 sps:$4 sm:$0xff]  }
 0x12b   :  { %2155 = vmatprep.subr.bf16.mxu1 %v5972_v23  ;;  %v6059_v23 = vld [vmem:[#allocation7 + $0x73c] ss:$48 sps:$4 sm:$0xff]  }
 0x12d   :  { %4383 = vmatpush1.bf16.msra.mxu0 %v6048_v41  ;;  %v6087_v41 = vld [vmem:[#allocation7 + $0x28] ss:$48 sps:$4 sm:$0xff]  }
 0x12e   :  { %2156 = vmatpush1.bf16.msra.mxu1 %v5970_v26  ;;  %4384 = vmatprep.subr.bf16.mxu0 %v6056_v42  ;;  %v6057_v26 = vld [vmem:[#allocation7 + $0x738] ss:$48 sps:$4 sm:$0xff]   ;;  %v6095_v42 = vld [vmem:[#allocation7 + $0x8c] ss:$48 sps:$4 sm:$0xff]  }
 0x12f   :  { %2157 = vmatprep.subr.bf16.mxu1 %v5978_v27  ;;  %v6065_v27 = vld [vmem:[#allocation7 + $0x79c] ss:$48 sps:$4 sm:$0xff]  }
 0x131   :  { %4385 = vmatpush1.bf16.msra.mxu0 %v6054_v45  ;;  %v6099_v45 = vld [vmem:[#allocation7 + $0xe8] ss:$48 sps:$4 sm:$0xff]  }
 0x132   :  { %2158 = vmatpush1.bf16.msra.mxu1 %v5976_v30  ;;  %4386 = vmatprep.subr.bf16.mxu0 %v6062_v46  ;;  %v6063_v30 = vld [vmem:[#allocation7 + $0x798] ss:$48 sps:$4 sm:$0xff]   ;;  %v389_v46 = vlaneseq }
 0x133   :  { %2159 = vmatprep.subr.bf16.mxu1 %v5984_v31  ;;  %v6071_v31 = vld [vmem:[#allocation7 + $0x7fc] ss:$48 sps:$4 sm:$0xff]  }
 0x135   :  { %4387 = vmatpush1.bf16.msra.mxu0 %v6060_v49  ;;  %v6795_v49 = vshrl.u32 %v389_v46, 7  ;;  %v6144_v46 = vld [vmem:[#allocation7 + $0x4a8] ss:$48 sps:$4 sm:$0xff]  }
 0x136   :  { %2160 = vmatpush1.bf16.msra.mxu1 %v5982_v35  ;;  %4388 = vmatprep.subr.bf16.mxu0 %v6068_v50  ;;  %v6069_v35 = vld [vmem:[#allocation7 + $0x7f8] ss:$48 sps:$4 sm:$0xff]   ;;  %v6113_v50 = vld [vmem:[#allocation7 + $0x1ac] ss:$48 sps:$4 sm:$0xff]  }
 0x137   :  { %2161 = vmatprep.subr.bf16.mxu1 %v5990_v36  ;;  %v6077_v36 = vld [vmem:[#allocation7 + $0x85c] ss:$48 sps:$4 sm:$0xff]  }
 0x139   :  { %4389 = vmatpush1.bf16.msra.mxu0 %v6066_v53  ;;  %v6800_v53 = vsub.s32 0, %v6795_v49 }
 0x13a   :  { %2162 = vmatpush1.bf16.msra.mxu1 %v5988_v39  ;;  %4390 = vmatprep.subr.bf16.mxu0 %v6074_v54  ;;  %v6081_v39 = vld [vmem:[#allocation7 + $0x8b8] ss:$48 sps:$4 sm:$0xff]   ;;  %v6119_v54 = vld [vmem:[#allocation7 + $0x20c] ss:$48 sps:$4 sm:$0xff]  }
 0x13b   :  { %2163 = vmatprep.subr.bf16.mxu1 %v5996_v40  ;;  %v6089_v40 = vld [vmem:[#allocation7 + $0x2c] ss:$48 sps:$4 sm:$0xff]  }
 0x13d   :  { %4391 = vmatpush1.bf16.msra.mxu0 %v6072_v57  ;;  %v6125_v57 = vld [vmem:[#allocation7 + $0x26c] ss:$48 sps:$4 sm:$0xff]  }
 0x13e   :  { %2164 = vmatpush1.bf16.msra.mxu1 %v5994_v43  ;;  %4392 = vmatprep.subr.bf16.mxu0 %v6080_v58  ;;  %v6093_v43 = vld [vmem:[#allocation7 + $0x88] ss:$48 sps:$4 sm:$0xff]  }
 0x13f   :  { %2165 = vmatprep.subr.bf16.mxu1 %v6002_v44  ;;  %v6101_v44 = vld [vmem:[#allocation7 + $0xec] ss:$48 sps:$4 sm:$0xff]  }
 0x141   :  { %4393 = vmatpush1.bf16.msra.mxu0 %v6078_v62 }
 0x142   :  { %2166 = vmatpush1.bf16.msra.mxu1 %v6000_v47  ;;  %4394 = vmatprep.subr.bf16.mxu0 %v6086_v63  ;;  %v6107_v47 = vld [vmem:[#allocation7 + $0x14c] ss:$48 sps:$4 sm:$0xff]   ;;  %v6123_v63 = vld [vmem:[#allocation7 + $0x268] ss:$48 sps:$4 sm:$0xff]  }
 0x143   :  { %2167 = vmatprep.subr.bf16.mxu1 %v6008_v48  ;;  %v6105_v48 = vld [vmem:[#allocation7 + $0x148] ss:$48 sps:$4 sm:$0xff]  }
 0x145   :  { %4395 = vmatpush1.bf16.msra.mxu0 %v6084_v2 }
 0x146   :  { %2168 = vmatpush1.bf16.msra.mxu1 %v6006_v51  ;;  %4396 = vmatprep.subr.bf16.mxu0 %v6092_v4  ;;  %v6111_v51 = vld [vmem:[#allocation7 + $0x1a8] ss:$48 sps:$4 sm:$0xff]  }
 0x147   :  { %2169 = vmatprep.subr.bf16.mxu1 %v6014_v52  ;;  %v6797_v52 = vld [vmem:[#allocation9] sm:$0xff] }
 0x149   :  { %4397 = vmatpush1.bf16.msra.mxu0 %v6090_v7  ;;  %v6129_v7 = vld [vmem:[#allocation7 + $0x2c8] ss:$48 sps:$4 sm:$0xff]  }
 0x14a   :  { %2170 = vmatpush1.bf16.msra.mxu1 %v6012_v55  ;;  %4398 = vmatprep.subr.bf16.mxu0 %v6098_v8  ;;  %v6117_v55 = vld [vmem:[#allocation7 + $0x208] ss:$48 sps:$4 sm:$0xff]  }
 0x14b   :  { %2171 = vmatprep.subr.bf16.mxu1 %v6020_v56  ;;  %v392_v56 = vrot.slane %v6797_v52, %v6800_v53 }
 0x14d   :  { %4399 = vmatpush1.bf16.msra.mxu0 %v6096_v11  ;;  %v6134_v11 = vld [vmem:[#allocation7 + $0x32c] ss:$48 sps:$4 sm:$0xff]  }
 0x14e   :  { %2172 = vmatpush1.bf16.msra.mxu1 %v6018_v59  ;;  %4400 = vmatprep.subr.bf16.mxu0 %v6104_v13 }
 0x14f   :  { %2173 = vmatprep.subr.bf16.mxu1 %v6026_v60 }
 0x151   :  { %4401 = vmatpush1.bf16.msra.mxu0 %v6102_v15  ;;  %v6132_v15 = vld [vmem:[#allocation7 + $0x328] ss:$48 sps:$4 sm:$0xff]  }
 0x152   :  { %2174 = vmatpush1.bf16.msra.mxu1 %v6024_v0  ;;  %4402 = vmatprep.subr.bf16.mxu0 %v6110_v16  ;;  %v6131_v0 = vld [vmem:[#allocation7 + $0x2cc] ss:$48 sps:$4 sm:$0xff]  }
 0x153   :  { %2175 = vmatprep.subr.bf16.mxu1 %v6032_v1  ;;  %v6156_v16 = vld [vmem:[#allocation10 + $0x180] ss:$12 sps:$4 sm:$0xff]  }
 0x155   :  { %4403 = vmatpush1.bf16.msra.mxu0 %v6108_v19  ;;  %v6162_v19 = vld [vmem:[#allocation10 + $0x198] ss:$12 sps:$4 sm:$0xff]  }
 0x156   :  { %2176 = vmatpush1.bf16.msra.mxu1 %v6030_v5  ;;  %4404 = vmatprep.subr.bf16.mxu0 %v6116_v21  ;;  %v6135_v21 = vld [vmem:[#allocation7 + $0x388] ss:$48 sps:$4 sm:$0xff]  }
 0x157   :  { %2177 = vmatprep.subr.bf16.mxu1 %v6035_v6 }
 0x159   :  { %4405 = vmatpush1.bf16.msra.mxu0 %v6114_v24  ;;  %v407_v24 = vsub.s32 4, %v6795_v49 }
 0x15a   :  { %2178 = vmatpush1.bf16.msra.mxu1 %v6033_v9  ;;  %4406 = vmatprep.subr.bf16.mxu0 %v6122_v25  ;;  %v411_v25 = vsub.s32 5, %v6795_v49 }
 0x15b   :  { %2190 = vmatprep.subr.bf16.mxu1 %v6041_v10 }
 0x15d   :  { %2180 = vmatmul.mubr.bf16.vlgmr.msra.gmra.mrb[8].mxu1 %v6772_v61  ;;  %4407 = vmatpush1.bf16.msra.mxu0 %v6120_v28  ;;  %v6143_v28 = vld [vmem:[#allocation7 + $0x44c] ss:$48 sps:$4 sm:$0xff]  }
 0x15e   :  { %2191 = vmatpush1.bf16.msra.mxu1 %v6039_v12  ;;  %2222 = vmatprep.mubr.bf16.mxu1 %v6668_v3 }
 0x15f   :  { %2192 = vmatprep.subr.bf16.mxu1 %v6047_v14  ;;  %4408 = vmatprep.subr.bf16.mxu0 %v6128_v29  ;;  %v6176_v29 = vld [vmem:[#allocation10 + $0x1cc] ss:$12 sps:$4 sm:$0xff]  }
 0x161   :  { %4409 = vmatpush1.bf16.msra.mxu0 %v6126_v32  ;;  %v6141_v32 = vld [vmem:[#allocation7 + $0x448] ss:$48 sps:$4 sm:$0xff]  }
 0x162   :  { %2193 = vmatpush1.bf16.msra.mxu1 %v6045_v17  ;;  %4421 = vmatprep.subr.bf16.mxu0 %v6158_v33  ;;  %v6137_v17 = vld [vmem:[#allocation7 + $0x38c] ss:$48 sps:$4 sm:$0xff]   ;;  %v6174_v33 = vld [vmem:[#allocation10 + $0x1c8] ss:$12 sps:$4 sm:$0xff]  }
 0x163   :  { %2194 = vmatprep.subr.bf16.mxu1 %v6053_v18  ;;  %v6164_v18 = vld [vmem:[#allocation10 + $0x19c] ss:$12 sps:$4 sm:$0xff]  }
 0x166   :  { %2195 = vmatpush1.bf16.msra.mxu1 %v6051_v22  ;;  %v6140_v22 = vld [vmem:[#allocation7 + $0x3ec] ss:$48 sps:$4 sm:$0xff]  }
 0x167   :  { %2196 = vmatprep.subr.bf16.mxu1 %v6059_v23  ;;  %v6170_v23 = vld [vmem:[#allocation10 + $0x1b4] ss:$12 sps:$4 sm:$0xff]  }
 0x16a   :  { %2197 = vmatpush1.bf16.msra.mxu1 %v6057_v26  ;;  %v6138_v26 = vld [vmem:[#allocation7 + $0x3e8] ss:$48 sps:$4 sm:$0xff]  }
 0x16b   :  { %2198 = vmatprep.subr.bf16.mxu1 %v6065_v27  ;;  %v6168_v27 = vld [vmem:[#allocation10 + $0x1b0] ss:$12 sps:$4 sm:$0xff]  }
 0x16e   :  { %2199 = vmatpush1.bf16.msra.mxu1 %v6063_v30  ;;  %v408_v30 = vrot.slane %v6797_v52, %v407_v24  ;;  %v6218_v24 = vld [vmem:[#allocation10 + $0x288] ss:$12 sps:$4 sm:$0xff]  }
 0x16f   :  { %2200 = vmatprep.subr.bf16.mxu1 %v6071_v31  ;;  %v412_v31 = vrot.slane %v6797_v52, %v411_v25  ;;  %v6225_v25 = vld [vmem:[#allocation10 + $0x2a4] ss:$12 sps:$4 sm:$0xff]  }
 0x172   :  { %2201 = vmatpush1.bf16.msra.mxu1 %v6069_v35  ;;  %v6146_v35 = vld [vmem:[#allocation7 + $0x4ac] ss:$48 sps:$4 sm:$0xff]  }
 0x173   :  { %2202 = vmatprep.subr.bf16.mxu1 %v6077_v36  ;;  %v6182_v36 = vld [vmem:[#allocation10 + $0x1e4] ss:$12 sps:$4 sm:$0xff]  }
 0x176   :  { %2203 = vmatpush1.bf16.msra.mxu1 %v6075_v37 }
 0x177   :  { %2204 = vmatprep.subr.bf16.mxu1 %v6083_v38 }
 0x17a   :  { %2205 = vmatpush1.bf16.msra.mxu1 %v6081_v39 }
 0x17b   :  { %2319 = vmatprep.subr.bf16.mxu1 %v6089_v40 }
 0x17d   :  { %2223 = vmatmul.mubr.bf16.vlgmr.msra.gmra.mrb[8].mxu1 %v6778_v34 }
 0x17e   :  { %2320 = vmatpush1.bf16.msra.mxu1 %v6087_v41  ;;  %2351 = vmatprep.mubr.bf16.mxu1 %v6768_v20  ;;  %v6803_v20 = vsub.s32 1, %v6795_v49 }
 0x17f   :  { %2321 = vmatprep.subr.bf16.mxu1 %v6095_v42  ;;  %v6180_v42 = vld [vmem:[#allocation10 + $0x1e0] ss:$12 sps:$4 sm:$0xff]  }
 0x180   :  { %v396_v58 = vrot.slane %v6797_v52, %v6803_v20 }
 0x182   :  { %2322 = vmatpush1.bf16.msra.mxu1 %v6093_v43 }
 0x183   :  { %2323 = vmatprep.subr.bf16.mxu1 %v6101_v44 }
 0x186   :  { %2324 = vmatpush1.bf16.msra.mxu1 %v6099_v45 }
 0x187   :  { %2325 = vmatprep.subr.bf16.mxu1 %v6107_v47 }
 0x18a   :  { %2326 = vmatpush1.bf16.msra.mxu1 %v6105_v48 }
 0x18b   :  { %2327 = vmatprep.subr.bf16.mxu1 %v6113_v50  ;;  %v6188_v50 = vld [vmem:[#allocation10 + $0x1fc] ss:$12 sps:$4 sm:$0xff]  }
 0x18e   :  { %2328 = vmatpush1.bf16.msra.mxu1 %v6111_v51  ;;  %v6149_v51 = vld [vmem:[#allocation7 + $0x50c] ss:$48 sps:$4 sm:$0xff]  }
 0x18f   :  { %2329 = vmatprep.subr.bf16.mxu1 %v6119_v54 }
 0x190   :  { %v1966_v59 = vpop.f32.mrb[0].mxu1 }
 0x191   :  { %v5615_v60 = vadd.f32 %v1966_v59, %v392_v56  ;;  %v1968_v62 = vpop.f32.mrb[1].mxu1  ;;  %v6152_v59 = vld [vmem:[#allocation7 + $0x56c] ss:$48 sps:$4 sm:$0xff]  }
 0x192   :  { %v5616_v1 = vadd.f32 %v1968_v62, %v396_v58  ;;  %v1970_v2 = vpop.f32.mrb[2].mxu1  ;;  %2330 = vmatpush1.bf16.msra.mxu1 %v6117_v55  ;;  %v6194_v62 = vld [vmem:[#allocation10 + $0x214] ss:$12 sps:$4 sm:$0xff]  }
 0x193   :  { %v5617_v4 = vadd.f32 %v1970_v2, %v392_v56  ;;  %v1972_v5 = vpop.f32.mrb[3].mxu1  ;;  %2331 = vmatprep.subr.bf16.mxu1 %v6125_v57  ;;  %v2405_v8 = vmax.f32 %v5615_v60, 0.0  ;;  %v6147_v56 = vld [vmem:[#allocation7 + $0x508] ss:$48 sps:$4 sm:$0xff]  }
 0x194   :  { %v5618_v6 = vadd.f32 %v1972_v5, %v396_v58  ;;  %v2406_v9 = vmax.f32 %v5616_v1, 0.0  ;;  %v6186_v58 = vld [vmem:[#allocation10 + $0x1f8] ss:$12 sps:$4 sm:$0xff]   ;;  %v6155_v1 = vld [vmem:[#allocation7 + $0x5cc] ss:$48 sps:$4 sm:$0xff]  }
 0x195   :  { %v2417_v10 = vmax.f32 %v5617_v4, 0.0  ;;  %v6200_v2 = vld [vmem:[#allocation10 + $0x22c] ss:$12 sps:$4 sm:$0xff]   ;;  %v6198_v5 = vld [vmem:[#allocation10 + $0x228] ss:$12 sps:$4 sm:$0xff]  }
 0x196   :  { %v2418_v12 = vmax.f32 %v5618_v6, 0.0  ;;  %2332 = vmatpush1.bf16.msra.mxu1 %v6123_v63  ;;  %v6150_v63 = vld [vmem:[#allocation7 + $0x568] ss:$48 sps:$4 sm:$0xff]   ;;  %v6161_v6 = vld [vmem:[#allocation7 + $0x62c] ss:$48 sps:$4 sm:$0xff]  }
 0x197   :  { %v6809_v13 = vpack.c.bf16 %v2417_v10, %v2405_v8  ;;  %2333 = vmatprep.subr.bf16.mxu1 %v6131_v0  ;;  %v2138_v37 = vpop.f32.mrb[0].mxu0  ;;  %v6192_v0 = vld [vmem:[#allocation10 + $0x210] ss:$12 sps:$4 sm:$0xff]   ;;  %v6204_v8 = vld [vmem:[#allocation10 + $0x240] ss:$12 sps:$4 sm:$0xff]  }
 0x198   :  { %v6811_v14 = vpack.c.bf16 %v2418_v12, %v2406_v9  ;;  %v5623_v38 = vadd.f32 %v2138_v37, %v408_v30  ;;  %v2140_v39 = vpop.f32.mrb[1].mxu0  ;;  %v6153_v4 = vld [vmem:[#allocation7 + $0x5c8] ss:$48 sps:$4 sm:$0xff]   ;;  %v6208_v12 = vld [vmem:[#allocation10 + $0x258] ss:$12 sps:$4 sm:$0xff]  }
 0x199   :  { %v5624_v40 = vadd.f32 %v2140_v39, %v412_v31  ;;  %v2142_v41 = vpop.f32.mrb[2].mxu0  ;;  %v6159_v9 = vld [vmem:[#allocation7 + $0x628] ss:$48 sps:$4 sm:$0xff]   ;;  %v6203_v37 = vld [vmem:[#allocation7 + $0x8cc] ss:$48 sps:$4 sm:$0xff]  }
 0x19a   :  { %2334 = vmatpush1.bf16.msra.mxu1 %v6129_v7  ;;  %4410 = vmatprep.mubr.bf16.mxu0 %v6811_v14  ;;  %v2409_v43 = vmax.f32 %v5623_v38, 0.0  ;;  %v5625_v44 = vadd.f32 %v2142_v41, %v408_v30  ;;  %v2144_v45 = vpop.f32.mrb[3].mxu0  ;;  %v6206_v7 = vld [vmem:[#allocation10 + $0x244] ss:$12 sps:$4 sm:$0xff]   ;;  %v6210_v10 = vld [vmem:[#allocation10 + $0x25c] ss:$12 sps:$4 sm:$0xff]  }
 0x19b   :  { %4411 = vmatmul.mubr.bf16.vlgmr.msra.gmra.mrb[8].mxu0 %v6809_v13  ;;  %2335 = vmatprep.subr.bf16.mxu1 %v6134_v11  ;;  %v2410_v47 = vmax.f32 %v5624_v40, 0.0  ;;  %v5626_v48 = vadd.f32 %v2144_v45, %v412_v31  ;;  %v6167_v11 = vld [vmem:[#allocation7 + $0x68c] ss:$48 sps:$4 sm:$0xff]   ;;  %v6228_v30 = vld [vmem:[#allocation10 + $0x2b8] ss:$12 sps:$4 sm:$0xff]  }
 0x19c   :  { %4422 = vmatpush1.bf16.msra.mxu0 %v6156_v16  ;;  %v2421_v54 = vmax.f32 %v5625_v44, 0.0  ;;  %v6173_v16 = vld [vmem:[#allocation7 + $0x6ec] ss:$48 sps:$4 sm:$0xff]   ;;  %v6238_v38 = vld [vmem:[#allocation10 + $0x2e8] ss:$12 sps:$4 sm:$0xff]  }
 0x19d   :  { %4423 = vmatprep.subr.bf16.mxu0 %v6164_v18  ;;  %v2422_v55 = vmax.f32 %v5626_v48, 0.0  ;;  %v6171_v18 = vld [vmem:[#allocation7 + $0x6e8] ss:$48 sps:$4 sm:$0xff]   ;;  %v6197_v31 = vld [vmem:[#allocation7 + $0x86c] ss:$48 sps:$4 sm:$0xff]  }
 0x19e   :  { %2336 = vmatpush1.bf16.msra.mxu1 %v6132_v15  ;;  %v6819_v57 = vpack.c.bf16 %v2421_v54, %v2409_v43  ;;  %v6165_v15 = vld [vmem:[#allocation7 + $0x688] ss:$48 sps:$4 sm:$0xff]   ;;  %v6245_v40 = vld [vmem:[#allocation10 + $0x304] ss:$12 sps:$4 sm:$0xff]   ;;  %v6207_v41 = vld [vmem:[#allocation10 + $0xc8] ss:$12 sps:$4 sm:$0xff]  }
 0x19f   :  { %2337 = vmatprep.subr.bf16.mxu1 %v6137_v17  ;;  %v6821_v60 = vpack.c.bf16 %v2422_v55, %v2410_v47  ;;  %v6215_v17 = vld [vmem:[#allocation10 + $0x274] ss:$12 sps:$4 sm:$0xff]   ;;  %v6201_v39 = vld [vmem:[#allocation7 + $0x8c8] ss:$48 sps:$4 sm:$0xff]   ;;  %v6217_v45 = vld [vmem:[#allocation10 + $0xf8] ss:$12 sps:$4 sm:$0xff]  }
 0x1a0   :  { %4424 = vmatpush1.bf16.msra.mxu0 %v6162_v19  ;;  %v6213_v19 = vld [vmem:[#allocation10 + $0x270] ss:$12 sps:$4 sm:$0xff]   ;;  %v6212_v43 = vld [vmem:[#allocation10 + $0xe0] ss:$12 sps:$4 sm:$0xff]   ;;  %v6231_v54 = vld [vmem:[#allocation10 + $0x68] ss:$12 sps:$4 sm:$0xff]  }
 0x1a1   :  { %4425 = vmatprep.subr.bf16.mxu0 %v6170_v23  ;;  %v6177_v23 = vld [vmem:[#allocation7 + $0x748] ss:$48 sps:$4 sm:$0xff]  }
 0x1a2   :  { %2338 = vmatpush1.bf16.msra.mxu1 %v6135_v21  ;;  %v6179_v21 = vld [vmem:[#allocation7 + $0x74c] ss:$48 sps:$4 sm:$0xff]  }
 0x1a3   :  { %2339 = vmatprep.subr.bf16.mxu1 %v6140_v22  ;;  %v6220_v22 = vld [vmem:[#allocation10 + $0x28c] ss:$12 sps:$4 sm:$0xff]   ;;  %v6222_v47 = vld [vmem:[#allocation10 + $0x110] ss:$12 sps:$4 sm:$0xff]  }
 0x1a4   :  { %4426 = vmatpush1.bf16.msra.mxu0 %v6168_v27  ;;  %v6191_v27 = vld [vmem:[#allocation7 + $0x80c] ss:$48 sps:$4 sm:$0xff]  }
 0x1a5   :  { %4427 = vmatprep.subr.bf16.mxu0 %v6176_v29  ;;  %v6189_v29 = vld [vmem:[#allocation7 + $0x808] ss:$48 sps:$4 sm:$0xff]  }
 0x1a6   :  { %2340 = vmatpush1.bf16.msra.mxu1 %v6138_v26  ;;  %v6183_v26 = vld [vmem:[#allocation7 + $0x7a8] ss:$48 sps:$4 sm:$0xff]  }
 0x1a7   :  { %2341 = vmatprep.subr.bf16.mxu1 %v6143_v28  ;;  %v6230_v28 = vld [vmem:[#allocation10 + $0x2bc] ss:$12 sps:$4 sm:$0xff]   ;;  %v6216_v44 = vld [vmem:[#allocation10 + $0x20] ss:$12 sps:$4 sm:$0xff]  }
 0x1a8   :  { %4428 = vmatpush1.bf16.msra.mxu0 %v6174_v33  ;;  %v6233_v33 = vld [vmem:[#allocation10 + $0x2d0] ss:$12 sps:$4 sm:$0xff]  }
 0x1a9   :  { %4429 = vmatprep.subr.bf16.mxu0 %v6182_v36  ;;  %v6240_v36 = vld [vmem:[#allocation10 + $0x2ec] ss:$12 sps:$4 sm:$0xff]   ;;  %v6226_v48 = vld [vmem:[#allocation10 + $0x50] ss:$12 sps:$4 sm:$0xff]  }
 0x1aa   :  { %2342 = vmatpush1.bf16.msra.mxu1 %v6141_v32  ;;  %v6235_v32 = vld [vmem:[#allocation10 + $0x2d4] ss:$12 sps:$4 sm:$0xff]  }
 0x1ab   :  { %2343 = vmatprep.subr.bf16.mxu1 %v6146_v35  ;;  %v6195_v35 = vld [vmem:[#allocation7 + $0x868] ss:$48 sps:$4 sm:$0xff]  }
 0x1ac   :  { %4430 = vmatpush1.bf16.msra.mxu0 %v6180_v42  ;;  %v6211_v42 = vld [vmem:[#allocation10 + $0x8] ss:$12 sps:$4 sm:$0xff]  }
 0x1ad   :  { %4431 = vmatprep.subr.bf16.mxu0 %v6188_v50  ;;  %v6227_v50 = vld [vmem:[#allocation10 + $0x128] ss:$12 sps:$4 sm:$0xff]  }
 0x1ae   :  { %2344 = vmatpush1.bf16.msra.mxu1 %v6144_v46  ;;  %v6221_v46 = vld [vmem:[#allocation10 + $0x38] ss:$12 sps:$4 sm:$0xff]  }
 0x1af   :  { %2345 = vmatprep.subr.bf16.mxu1 %v6149_v51  ;;  %v6828_v51 = vsub.s32 2, %v6795_v49 }
 0x1b0   :  { %4432 = vmatpush1.bf16.msra.mxu0 %v6186_v58  ;;  %v6236_v58 = vld [vmem:[#allocation10 + $0x80] ss:$12 sps:$4 sm:$0xff]  }
 0x1b1   :  { %4433 = vmatprep.subr.bf16.mxu0 %v6194_v62  ;;  %v400_v55 = vrot.slane %v6797_v52, %v6828_v51 }
 0x1b2   :  { %2346 = vmatpush1.bf16.msra.mxu1 %v6147_v56 }
 0x1b3   :  { %2347 = vmatprep.subr.bf16.mxu1 %v6152_v59  ;;  %v6237_v59 = vld [vmem:[#allocation10 + $0x158] ss:$12 sps:$4 sm:$0xff]  }
 0x1b4   :  { %4434 = vmatpush1.bf16.msra.mxu0 %v6192_v0 }
 0x1b5   :  { %4435 = vmatprep.subr.bf16.mxu0 %v6200_v2 }
 0x1b6   :  { %2348 = vmatpush1.bf16.msra.mxu1 %v6150_v63 }
 0x1b7   :  { %2349 = vmatprep.subr.bf16.mxu1 %v6155_v1 }
 0x1b8   :  { %4436 = vmatpush1.bf16.msra.mxu0 %v6198_v5 }
 0x1b9   :  { %4437 = vmatprep.subr.bf16.mxu0 %v6206_v7  ;;  %v6242_v7 = vld [vmem:[#allocation10 + $0x170] ss:$12 sps:$4 sm:$0xff]  }
 0x1ba   :  { %2350 = vmatpush1.bf16.msra.mxu1 %v6153_v4  ;;  %v6241_v4 = vld [vmem:[#allocation10 + $0x98] ss:$12 sps:$4 sm:$0xff]  }
 0x1bb   :  { %2362 = vmatprep.subr.bf16.mxu1 %v6161_v6 }
 0x1bc   :  { %4438 = vmatpush1.bf16.msra.mxu0 %v6204_v8 }
 0x1bd   :  { %2352 = vmatmul.mubr.bf16.vlgmr.msra.gmra.mrb[12].mxu1 %v6772_v61  ;;  %4439 = vmatprep.subr.bf16.mxu0 %v6210_v10  ;;  %v6185_v61 = vld [vmem:[#allocation7 + $0x7ac] ss:$48 sps:$4 sm:$0xff]  }
 0x1be   :  { %2363 = vmatpush1.bf16.msra.mxu1 %v6159_v9  ;;  %2394 = vmatprep.mubr.bf16.mxu1 %v6668_v3  ;;  %v6223_v3 = vld [vmem:[#allocation10 + $0x2a0] ss:$12 sps:$4 sm:$0xff]  }
 0x1bf   :  { %2364 = vmatprep.subr.bf16.mxu1 %v6167_v11 }
 0x1c0   :  { %4440 = vmatpush1.bf16.msra.mxu0 %v6208_v12 }
 0x1c1   :  { %4441 = vmatprep.subr.bf16.mxu0 %v6215_v17 }
 0x1c2   :  { %2365 = vmatpush1.bf16.msra.mxu1 %v6165_v15 }
 0x1c3   :  { %2366 = vmatprep.subr.bf16.mxu1 %v6173_v16  ;;  %v6247_v16 = vld [vmem:[#allocation10 + $0x248] ss:$12 sps:$4 sm:$0xff]  }
 0x1c4   :  { %4442 = vmatpush1.bf16.msra.mxu0 %v6213_v19  ;;  %v6250_v19 = vld [vmem:[#allocation10 + $0x31c] ss:$12 sps:$4 sm:$0xff]  }
 0x1c5   :  { %4443 = vmatprep.subr.bf16.mxu0 %v6220_v22  ;;  %v6252_v22 = vld [vmem:[#allocation10 + $0x260] ss:$12 sps:$4 sm:$0xff]  }
 0x1c6   :  { %2367 = vmatpush1.bf16.msra.mxu1 %v6171_v18  ;;  %v6243_v18 = vld [vmem:[#allocation10 + $0x300] ss:$12 sps:$4 sm:$0xff]  }
 0x1c7   :  { %2368 = vmatprep.subr.bf16.mxu1 %v6179_v21  ;;  %v6251_v21 = vld [vmem:[#allocation10 + $0x188] ss:$12 sps:$4 sm:$0xff]  }
 0x1c8   :  { %4444 = vmatpush1.bf16.msra.mxu0 %v6218_v24  ;;  %v6255_v24 = vld [vmem:[#allocation10 + $0x334] ss:$12 sps:$4 sm:$0xff]  }
 0x1c9   :  { %4445 = vmatprep.subr.bf16.mxu0 %v6225_v25  ;;  %v6257_v25 = vld [vmem:[#allocation10 + $0x278] ss:$12 sps:$4 sm:$0xff]  }
 0x1ca   :  { %2369 = vmatpush1.bf16.msra.mxu1 %v6177_v23  ;;  %v6248_v23 = vld [vmem:[#allocation10 + $0x318] ss:$12 sps:$4 sm:$0xff]  }
 0x1cb   :  { %2370 = vmatprep.subr.bf16.mxu1 %v6185_v61  ;;  %v6256_v61 = vld [vmem:[#allocation10 + $0x1a0] ss:$12 sps:$4 sm:$0xff]  }
 0x1cc   :  { %4446 = vmatpush1.bf16.msra.mxu0 %v6223_v3  ;;  %v6253_v3 = vld [vmem:[#allocation10 + $0x330] ss:$12 sps:$4 sm:$0xff]  }
 0x1cd   :  { %4447 = vmatprep.subr.bf16.mxu0 %v6230_v28  ;;  %v6261_v28 = vld [vmem:[#allocation10 + $0x1b8] ss:$12 sps:$4 sm:$0xff]  }
 0x1ce   :  { %2371 = vmatpush1.bf16.msra.mxu1 %v6183_v26  ;;  %v6841_v26 = vld [vmem:[#allocation9 + $0x8] sm:$0xf] }
 0x1cf   :  { %2372 = vmatprep.subr.bf16.mxu1 %v6191_v27  ;;  %v6260_v27 = vld [vmem:[#allocation10 + $0x34c] ss:$12 sps:$4 sm:$0xff]  }
 0x1d0   :  { %4448 = vmatpush1.bf16.msra.mxu0 %v6228_v30  ;;  %v428_v30 = vrot.slane %v6841_v26, %v6803_v20 }
 0x1d1   :  { %4449 = vmatprep.subr.bf16.mxu0 %v6235_v32  ;;  %v6265_v32 = vld [vmem:[#allocation10 + $0x364] ss:$12 sps:$4 sm:$0xff]  }
 0x1d2   :  { %2373 = vmatpush1.bf16.msra.mxu1 %v6189_v29  ;;  %v424_v29 = vrot.slane %v6841_v26, %v6800_v53 }
 0x1d3   :  { %2374 = vmatprep.subr.bf16.mxu1 %v6197_v31  ;;  %v6258_v31 = vld [vmem:[#allocation10 + $0x348] ss:$12 sps:$4 sm:$0xff]  }
 0x1d4   :  { %4450 = vmatpush1.bf16.msra.mxu0 %v6233_v33 }
 0x1d5   :  { %4451 = vmatprep.subr.bf16.mxu0 %v6240_v36 }
 0x1d6   :  { %2375 = vmatpush1.bf16.msra.mxu1 %v6195_v35  ;;  %v6266_v35 = vld [vmem:[#allocation10 + $0x1d0] ss:$12 sps:$4 sm:$0xff]  }
 0x1d7   :  { %2376 = vmatprep.subr.bf16.mxu1 %v6203_v37 }
 0x1d8   :  { %4452 = vmatpush1.bf16.msra.mxu0 %v6238_v38  ;;  %v6267_v38 = vld [vmem:[#allocation10 + $0x2a8] ss:$12 sps:$4 sm:$0xff]  }
 0x1d9   :  { %4464 = vmatprep.subr.bf16.mxu0 %v6245_v40 }
 0x1da   :  { %2377 = vmatpush1.bf16.msra.mxu1 %v6201_v39 }
 0x1db   :  { %5483 = vmatprep.subr.bf16.mxu1 %v6207_v41  ;;  %v6263_v41 = vld [vmem:[#allocation10 + $0x360] ss:$12 sps:$4 sm:$0xff]  }
 0x1dd   :  { %2395 = vmatmul.mubr.bf16.vlgmr.msra.gmra.mrb[12].mxu1 %v6778_v34  ;;  %v403_v34 = vsub.s32 3, %v6795_v49 }
 0x1de   :  { %5484 = vmatpush3.bf16.msra.mxu1 %v6211_v42  ;;  %4668 = vmatprep.mubr.bf16.mxu1 %v6811_v14  ;;  %v6232_v14 = vld [vmem:[#allocation10 + $0x140] ss:$12 sps:$4 sm:$0xff]  }
 0x1df   :  { %5485 = vmatprep.subr.bf16.mxu1 %v6212_v43  ;;  %v404_v56 = vrot.slane %v6797_v52, %v403_v34  ;;  %v6246_v52 = vld [vmem:[#allocation10 + $0xb0] ss:$12 sps:$4 sm:$0xff]  }
 0x1e2   :  { %5486 = vmatpush3.bf16.msra.mxu1 %v6216_v44 }
 0x1e3   :  { %5487 = vmatprep.subr.bf16.mxu1 %v6217_v45  ;;  %v6270_v45 = vld [vmem:[#allocation10 + $0x37c] ss:$12 sps:$4 sm:$0xff]  }
 0x1e6   :  { %5488 = vmatpush3.bf16.msra.mxu1 %v6221_v46 }
 0x1e7   :  { %5489 = vmatprep.subr.bf16.mxu1 %v6222_v47 }
 0x1ea   :  { %5490 = vmatpush3.bf16.msra.mxu1 %v6226_v48  ;;  %v6271_v48 = vld [vmem:[#allocation10 + $0x1e8] ss:$12 sps:$4 sm:$0xff]  }
 0x1eb   :  { %5491 = vmatprep.subr.bf16.mxu1 %v6227_v50 }
 0x1ee   :  { %5492 = vmatpush3.bf16.msra.mxu1 %v6231_v54  ;;  %v6272_v54 = vld [vmem:[#allocation10 + $0x2c0] ss:$12 sps:$4 sm:$0xff]  }
 0x1ef   :  { %5493 = vmatprep.subr.bf16.mxu1 %v6232_v14 }
 0x1f0   :  { %v2052_v62 = vpop.f32.mrb[4].mxu1 }
 0x1f1   :  { %v5619_v63 = vadd.f32 %v2052_v62, %v400_v55  ;;  %v2054_v0 = vpop.f32.mrb[5].mxu1  ;;  %v6276_v62 = vld [vmem:[#allocation10 + $0x200] ss:$12 sps:$4 sm:$0xff]  }
 0x1f2   :  { %v5620_v1 = vadd.f32 %v2054_v0, %v404_v56  ;;  %v2056_v2 = vpop.f32.mrb[6].mxu1  ;;  %5494 = vmatpush3.bf16.msra.mxu1 %v6236_v58  ;;  %v6275_v58 = vld [vmem:[#allocation10 + $0x394] ss:$12 sps:$4 sm:$0xff]   ;;  %v6273_v0 = vld [vmem:[#allocation10 + $0x390] ss:$12 sps:$4 sm:$0xff]  }
 0x1f3   :  { %v5621_v5 = vadd.f32 %v2056_v2, %v400_v55  ;;  %v2058_v6 = vpop.f32.mrb[7].mxu1  ;;  %5495 = vmatprep.subr.bf16.mxu1 %v6237_v59  ;;  %v2407_v9 = vmax.f32 %v5619_v63, 0.0  ;;  %v6268_v55 = vld [vmem:[#allocation10 + $0x378] ss:$12 sps:$4 sm:$0xff]  }
 0x1f4   :  { %v5622_v8 = vadd.f32 %v2058_v6, %v404_v56  ;;  %v2408_v11 = vmax.f32 %v5620_v1, 0.0  ;;  %v6277_v63 = vld [vmem:[#allocation10 + $0x2d8] ss:$12 sps:$4 sm:$0xff]  }
 0x1f5   :  { %v2419_v10 = vmax.f32 %v5621_v5, 0.0  ;;  %v6280_v1 = vld [vmem:[#allocation10 + $0x3ac] ss:$12 sps:$4 sm:$0xff]   ;;  %v6278_v5 = vld [vmem:[#allocation10 + $0x3a8] ss:$12 sps:$4 sm:$0xff]  }
 0x1f6   :  { %v2420_v12 = vmax.f32 %v5622_v8, 0.0  ;;  %5496 = vmatpush3.bf16.msra.mxu1 %v6241_v4  ;;  %v6281_v2 = vld [vmem:[#allocation10 + $0x218] ss:$12 sps:$4 sm:$0xff]   ;;  %v6282_v4 = vld [vmem:[#allocation10 + $0x2f0] ss:$12 sps:$4 sm:$0xff]  }
 0x1f7   :  { %v6836_v15 = vpack.c.bf16 %v2419_v10, %v2407_v9  ;;  %5497 = vmatprep.subr.bf16.mxu1 %v6242_v7  ;;  %v2310_v33 = vpop.f32.mrb[4].mxu0  ;;  %v6285_v6 = vld [vmem:[#allocation10 + $0x3c4] ss:$12 sps:$4 sm:$0xff]   ;;  %v6287_v8 = vld [vmem:[#allocation10 + $0x3c8] ss:$12 sps:$4 sm:$0xff]  }
 0x1f8   :  { %v2432_v17 = vpack.c.bf16 %v2420_v12, %v2408_v11  ;;  %v5631_v36 = vadd.f32 %v2310_v33, %v424_v29  ;;  %v2312_v37 = vpop.f32.mrb[5].mxu0  ;;  %v6286_v7 = vld [vmem:[#allocation10 + $0x230] ss:$12 sps:$4 sm:$0xff]   ;;  %v6283_v9 = vld [vmem:[#allocation10 + $0x3c0] ss:$12 sps:$4 sm:$0xff]  }
 0x1f9   :  { %v5632_v39 = vadd.f32 %v2312_v37, %v428_v30  ;;  %v2314_v40 = vpop.f32.mrb[6].mxu0  ;;  %v6290_v10 = vld [vmem:[#allocation10 + $0x3dc] ss:$12 sps:$4 sm:$0xff]   ;;  %v6292_v12 = vld [vmem:[#allocation10 + $0x3e0] ss:$12 sps:$4 sm:$0xff]  }
 0x1fa   :  { %4453 = vmatprep.mubr.bf16.mxu0 %v2432_v17  ;;  %5498 = vmatpush3.bf16.msra.mxu1 %v6246_v52  ;;  %v2413_v42 = vmax.f32 %v5631_v36, 0.0  ;;  %v5633_v43 = vadd.f32 %v2314_v40, %v424_v29  ;;  %v2316_v44 = vpop.f32.mrb[7].mxu0  ;;  %v6291_v11 = vld [vmem:[#allocation10 + $0x308] ss:$12 sps:$4 sm:$0xff]   ;;  %v6288_v52 = vld [vmem:[#allocation10 + $0x3d8] ss:$12 sps:$4 sm:$0xff]  }
 0x1fb   :  { %4454 = vmatmul.mubr.bf16.vlgmr.msra.gmra.mrb[8].mxu0 %v6836_v15  ;;  %5505 = vmatprep.subr.bf16.mxu1 %v6247_v16  ;;  %v2414_v46 = vmax.f32 %v5632_v39, 0.0  ;;  %v5634_v47 = vadd.f32 %v2316_v44, %v428_v30  ;;  %v6295_v16 = vld [vmem:[#allocation10 + $0x3f4] ss:$12 sps:$4 sm:$0xff]   ;;  %v6308_v29 = vld [vmem:[#allocation10 + $0x438] ss:$12 sps:$4 sm:$0xff]  }
 0x1fc   :  { %4465 = vmatpush1.bf16.msra.mxu0 %v6243_v18  ;;  %4496 = vmatprep.mubr.bf16.mxu0 %v6821_v60  ;;  %v2425_v50 = vmax.f32 %v5633_v43, 0.0  ;;  %v6297_v18 = vld [vmem:[#allocation10 + $0x3f8] ss:$12 sps:$4 sm:$0xff]   ;;  %v6316_v30 = vld [vmem:[#allocation10 + $0x380] ss:$12 sps:$4 sm:$0xff]  }
 0x1fd   :  { %4669 = vmatmul.mubr.bf16.vlgmr.msra.gmra.mrb[16].mxu1 %v6809_v13  ;;  %4466 = vmatprep.subr.bf16.mxu0 %v6250_v19  ;;  %v6262_v13 = vld [vmem:[#allocation10 + $0x290] ss:$12 sps:$4 sm:$0xff]   ;;  %v2426_v14 = vmax.f32 %v5634_v47, 0.0  ;;  %v6320_v33 = vld [vmem:[#allocation10 + $0x46c] ss:$12 sps:$4 sm:$0xff]  }
 0x1fe   :  { %5506 = vmatpush3.bf16.msra.mxu1 %v6251_v21  ;;  %4709 = vmatprep.mubr.bf16.mxu1 %v2432_v17  ;;  %v6847_v56 = vpack.c.bf16 %v2425_v50, %v2413_v42  ;;  %v6296_v17 = vld [vmem:[#allocation10 + $0x320] ss:$12 sps:$4 sm:$0xff]   ;;  %v6293_v19 = vld [vmem:[#allocation10 + $0x3f0] ss:$12 sps:$4 sm:$0xff]   ;;  %v6318_v37 = vld [vmem:[#allocation10 + $0x468] ss:$12 sps:$4 sm:$0xff]  }
 0x1ff   :  { %5507 = vmatprep.subr.bf16.mxu1 %v6252_v22  ;;  %v6849_v59 = vpack.c.bf16 %v2426_v14, %v2414_v46  ;;  %v6300_v21 = vld [vmem:[#allocation10 + $0x40c] ss:$12 sps:$4 sm:$0xff]   ;;  %v6322_v36 = vld [vmem:[#allocation10 + $0x470] ss:$12 sps:$4 sm:$0xff]   ;;  %v6327_v40 = vld [vmem:[#allocation10 + $0x548] ss:$12 sps:$4 sm:$0xff]  }
 0x200   :  { %4467 = vmatpush1.bf16.msra.mxu0 %v6248_v23  ;;  %v6301_v22 = vld [vmem:[#allocation10 + $0x338] ss:$12 sps:$4 sm:$0xff]   ;;  %v6302_v23 = vld [vmem:[#allocation10 + $0x410] ss:$12 sps:$4 sm:$0xff]   ;;  %v6331_v43 = vld [vmem:[#allocation10 + $0x488] ss:$12 sps:$4 sm:$0xff]  }
 0x201   :  { %4468 = vmatprep.subr.bf16.mxu0 %v6255_v24  ;;  %v6298_v24 = vld [vmem:[#allocation10 + $0x408] ss:$12 sps:$4 sm:$0xff]   ;;  %v6326_v39 = vld [vmem:[#allocation10 + $0x3b0] ss:$12 sps:$4 sm:$0xff]   ;;  %v6332_v44 = vld [vmem:[#allocation10 + $0x560] ss:$12 sps:$4 sm:$0xff]  }
 0x202   :  { %5508 = vmatpush3.bf16.msra.mxu1 %v6256_v61  ;;  %v6306_v61 = vld [vmem:[#allocation10 + $0x350] ss:$12 sps:$4 sm:$0xff]   ;;  %v6335_v46 = vld [vmem:[#allocation10 + $0x4b4] ss:$12 sps:$4 sm:$0xff]   ;;  %v6341_v14 = vld [vmem:[#allocation10 + $0x4b8] ss:$12 sps:$4 sm:$0xff]  }
 0x203   :  { %5509 = vmatprep.subr.bf16.mxu1 %v6257_v25  ;;  %v6307_v25 = vld [vmem:[#allocation10 + $0x428] ss:$12 sps:$4 sm:$0xff]   ;;  %v6336_v47 = vld [vmem:[#allocation10 + $0x4a0] ss:$12 sps:$4 sm:$0xff]   ;;  %v6333_v50 = vld [vmem:[#allocation10 + $0x4b0] ss:$12 sps:$4 sm:$0xff]  }
 0x204   :  { %4469 = vmatpush1.bf16.msra.mxu0 %v6253_v3  ;;  %v6310_v3 = vld [vmem:[#allocation10 + $0x43c] ss:$12 sps:$4 sm:$0xff]  }
 0x205   :  { %4470 = vmatprep.subr.bf16.mxu0 %v6260_v27  ;;  %v6311_v27 = vld [vmem:[#allocation10 + $0x368] ss:$12 sps:$4 sm:$0xff]  }
 0x206   :  { %5510 = vmatpush3.bf16.msra.mxu1 %v6261_v28  ;;  %v6312_v28 = vld [vmem:[#allocation10 + $0x440] ss:$12 sps:$4 sm:$0xff]   ;;  %v6330_v42 = vld [vmem:[#allocation10 + $0x49c] ss:$12 sps:$4 sm:$0xff]  }
 0x207   :  { %5511 = vmatprep.subr.bf16.mxu1 %v6262_v13  ;;  %v6315_v13 = vld [vmem:[#allocation10 + $0x454] ss:$12 sps:$4 sm:$0xff]  }
 0x208   :  { %4471 = vmatpush1.bf16.msra.mxu0 %v6258_v31  ;;  %v6317_v31 = vld [vmem:[#allocation10 + $0x458] ss:$12 sps:$4 sm:$0xff]  }
 0x209   :  { %4472 = vmatprep.subr.bf16.mxu0 %v6265_v32  ;;  %v6313_v32 = vld [vmem:[#allocation10 + $0x450] ss:$12 sps:$4 sm:$0xff]  }
 0x20a   :  { %5512 = vmatpush3.bf16.msra.mxu1 %v6266_v35  ;;  %v6321_v35 = vld [vmem:[#allocation10 + $0x398] ss:$12 sps:$4 sm:$0xff]  }
 0x20b   :  { %5513 = vmatprep.subr.bf16.mxu1 %v6267_v38  ;;  %v6325_v38 = vld [vmem:[#allocation10 + $0x484] ss:$12 sps:$4 sm:$0xff]  }
 0x20c   :  { %4473 = vmatpush1.bf16.msra.mxu0 %v6263_v41  ;;  %v6323_v41 = vld [vmem:[#allocation10 + $0x480] ss:$12 sps:$4 sm:$0xff]  }
 0x20d   :  { %4474 = vmatprep.subr.bf16.mxu0 %v6270_v45  ;;  %v6328_v45 = vld [vmem:[#allocation10 + $0x498] ss:$12 sps:$4 sm:$0xff]  }
 0x20e   :  { %5514 = vmatpush3.bf16.msra.mxu1 %v6271_v48  ;;  %v6337_v48 = vld [vmem:[#allocation10 + $0x578] ss:$12 sps:$4 sm:$0xff]  }
 0x20f   :  { %5515 = vmatprep.subr.bf16.mxu1 %v6272_v54  ;;  %v6340_v54 = vld [vmem:[#allocation10 + $0x4cc] ss:$12 sps:$4 sm:$0xff]  }
 0x210   :  { %4475 = vmatpush1.bf16.msra.mxu0 %v6268_v55  ;;  %v6342_v55 = vld [vmem:[#allocation10 + $0x590] ss:$12 sps:$4 sm:$0xff]  }
 0x211   :  { %4476 = vmatprep.subr.bf16.mxu0 %v6275_v58  ;;  %v6338_v58 = vld [vmem:[#allocation10 + $0x4c8] ss:$12 sps:$4 sm:$0xff]  }
 0x212   :  { %5516 = vmatpush3.bf16.msra.mxu1 %v6276_v62  ;;  %v6345_v62 = vld [vmem:[#allocation10 + $0x4e4] ss:$12 sps:$4 sm:$0xff]  }
 0x213   :  { %5517 = vmatprep.subr.bf16.mxu1 %v6277_v63  ;;  %v6347_v63 = vld [vmem:[#allocation10 + $0x5a8] ss:$12 sps:$4 sm:$0xff]  }
 0x214   :  { %4477 = vmatpush1.bf16.msra.mxu0 %v6273_v0  ;;  %v6343_v0 = vld [vmem:[#allocation10 + $0x4e0] ss:$12 sps:$4 sm:$0xff]  }
 0x215   :  { %4478 = vmatprep.subr.bf16.mxu0 %v6280_v1  ;;  %v6350_v1 = vld [vmem:[#allocation10 + $0x4fc] ss:$12 sps:$4 sm:$0xff]  }
 0x216   :  { %5518 = vmatpush3.bf16.msra.mxu1 %v6281_v2  ;;  %v415_v2 = vsub.s32 6, %v6795_v49 }
 0x217   :  { %5519 = vmatprep.subr.bf16.mxu1 %v6282_v4  ;;  %v6351_v4 = vld [vmem:[#allocation10 + $0x4e8] ss:$12 sps:$4 sm:$0xff]  }
 0x218   :  { %4479 = vmatpush1.bf16.msra.mxu0 %v6278_v5  ;;  %v419_v5 = vsub.s32 7, %v6795_v49  ;;  %v6470_v49 = vld [vmem:[#allocation10 + $0x784] ss:$12 sps:$4 sm:$0xff]  }
 0x219   :  { %4480 = vmatprep.subr.bf16.mxu0 %v6285_v6  ;;  %v6352_v6 = vld [vmem:[#allocation10 + $0x5c0] ss:$12 sps:$4 sm:$0xff]  }
 0x21a   :  { %5520 = vmatpush3.bf16.msra.mxu1 %v6286_v7  ;;  %v6348_v7 = vld [vmem:[#allocation10 + $0x4f8] ss:$12 sps:$4 sm:$0xff]  }
 0x21b   :  { %5527 = vmatprep.subr.bf16.mxu1 %v6287_v8  ;;  %v6516_v8 = vld [vmem:[#allocation9] sm:$0xff] }
 0x21c   :  { %4481 = vmatpush1.bf16.msra.mxu0 %v6283_v9  ;;  %v416_v9 = vrot.slane %v6516_v8, %v415_v2  ;;  %v6397_v2 = vld [vmem:[#allocation10 + $0x758] ss:$12 sps:$4 sm:$0xff]  }
 0x21d   :  { %4710 = vmatmul.mubr.bf16.vlgmr.msra.gmra.mrb[20].mxu1 %v6836_v15  ;;  %4482 = vmatprep.subr.bf16.mxu0 %v6290_v10  ;;  %v6305_v15 = vld [vmem:[#allocation10 + $0x424] ss:$12 sps:$4 sm:$0xff]   ;;  %v6355_v10 = vld [vmem:[#allocation10 + $0x514] ss:$12 sps:$4 sm:$0xff]  }
 0x21e   :  { %5528 = vmatpush3.bf16.msra.mxu1 %v6291_v11  ;;  %4750 = vmatprep.mubr.bf16.mxu1 %v6821_v60  ;;  %v6303_v60 = vld [vmem:[#allocation10 + $0x420] ss:$12 sps:$4 sm:$0xff]   ;;  %v420_v11 = vrot.slane %v6516_v8, %v419_v5  ;;  %v6398_v8 = vld [vmem:[#allocation10 + $0x5e8] ss:$12 sps:$4 sm:$0xff]  }
 0x21f   :  { %5529 = vmatprep.subr.bf16.mxu1 %v6292_v12  ;;  %v6356_v12 = vld [vmem:[#allocation10 + $0x500] ss:$12 sps:$4 sm:$0xff]  }
 0x220   :  { %4483 = vmatpush1.bf16.msra.mxu0 %v6288_v52  ;;  %v6357_v52 = vld [vmem:[#allocation10 + $0x5d8] ss:$12 sps:$4 sm:$0xff]  }
 0x221   :  { %4484 = vmatprep.subr.bf16.mxu0 %v6295_v16  ;;  %v6400_v5 = vld [vmem:[#allocation10 + $0x5ec] ss:$12 sps:$4 sm:$0xff]  }
 0x222   :  { %5530 = vmatpush3.bf16.msra.mxu1 %v6296_v17  ;;  %v6353_v17 = vld [vmem:[#allocation10 + $0x510] ss:$12 sps:$4 sm:$0xff]  }
 0x223   :  { %5531 = vmatprep.subr.bf16.mxu1 %v6297_v18 }
 0x224   :  { %4485 = vmatpush1.bf16.msra.mxu0 %v6293_v19 }
 0x225   :  { %4486 = vmatprep.subr.bf16.mxu0 %v6300_v21  ;;  %v6360_v21 = vld [vmem:[#allocation10 + $0x52c] ss:$12 sps:$4 sm:$0xff]  }
 0x226   :  { %5532 = vmatpush3.bf16.msra.mxu1 %v6301_v22 }
 0x227   :  { %5533 = vmatprep.subr.bf16.mxu1 %v6302_v23 }
 0x228   :  { %4487 = vmatpush1.bf16.msra.mxu0 %v6298_v24  ;;  %v6361_v24 = vld [vmem:[#allocation10 + $0x518] ss:$12 sps:$4 sm:$0xff]  }
 0x229   :  { %4488 = vmatprep.subr.bf16.mxu0 %v6305_v15 }
 0x22a   :  { %5534 = vmatpush3.bf16.msra.mxu1 %v6306_v61 }
 0x22b   :  { %5535 = vmatprep.subr.bf16.mxu1 %v6307_v25 }
 0x22c   :  { %4489 = vmatpush1.bf16.msra.mxu0 %v6303_v60  ;;  %v6362_v60 = vld [vmem:[#allocation10 + $0x5f0] ss:$12 sps:$4 sm:$0xff]  }
 0x22d   :  { %4490 = vmatprep.subr.bf16.mxu0 %v6310_v3 }
 0x22e   :  { %5536 = vmatpush3.bf16.msra.mxu1 %v6311_v27  ;;  %v6358_v27 = vld [vmem:[#allocation10 + $0x528] ss:$12 sps:$4 sm:$0xff]  }
 0x22f   :  { %5537 = vmatprep.subr.bf16.mxu1 %v6312_v28 }
 0x230   :  { %4491 = vmatpush1.bf16.msra.mxu0 %v6308_v29  ;;  %v6365_v29 = vld [vmem:[#allocation10 + $0x544] ss:$12 sps:$4 sm:$0xff]  }
 0x231   :  { %4492 = vmatprep.subr.bf16.mxu0 %v6315_v13 }
 0x232   :  { %5538 = vmatpush3.bf16.msra.mxu1 %v6316_v30 }
 0x233   :  { %5539 = vmatprep.subr.bf16.mxu1 %v6317_v31  ;;  %v6366_v31 = vld [vmem:[#allocation10 + $0x530] ss:$12 sps:$4 sm:$0xff]  }
 0x234   :  { %4493 = vmatpush1.bf16.msra.mxu0 %v6313_v32 }
 0x235   :  { %4494 = vmatprep.subr.bf16.mxu0 %v6320_v33  ;;  %v6367_v33 = vld [vmem:[#allocation10 + $0x6c8] ss:$12 sps:$4 sm:$0xff]  }
 0x236   :  { %5540 = vmatpush3.bf16.msra.mxu1 %v6321_v35 }
 0x237   :  { %5541 = vmatprep.subr.bf16.mxu1 %v6322_v36  ;;  %v6363_v36 = vld [vmem:[#allocation10 + $0x540] ss:$12 sps:$4 sm:$0xff]  }
 0x238   :  { %4495 = vmatpush1.bf16.msra.mxu0 %v6318_v37  ;;  %v6370_v37 = vld [vmem:[#allocation10 + $0x55c] ss:$12 sps:$4 sm:$0xff]  }
 0x239   :  { %4507 = vmatprep.subr.bf16.mxu0 %v6325_v38  ;;  %v6371_v38 = vld [vmem:[#allocation10 + $0x608] ss:$12 sps:$4 sm:$0xff]  }
 0x23a   :  { %5542 = vmatpush3.bf16.msra.mxu1 %v6326_v39  ;;  %v6372_v39 = vld [vmem:[#allocation10 + $0x6e0] ss:$12 sps:$4 sm:$0xff]  }
 0x23b   :  { %4497 = vmatmul.mubr.bf16.vlgmr.msra.gmra.mrb[8].mxu0 %v6819_v57  ;;  %5549 = vmatprep.subr.bf16.mxu1 %v6327_v40  ;;  %v6368_v40 = vld [vmem:[#allocation10 + $0x558] ss:$12 sps:$4 sm:$0xff]  }
 0x23c   :  { %4508 = vmatpush1.bf16.msra.mxu0 %v6323_v41  ;;  %v6375_v41 = vld [vmem:[#allocation10 + $0x574] ss:$12 sps:$4 sm:$0xff]  }
 0x23d   :  { %4751 = vmatmul.mubr.bf16.vlgmr.msra.gmra.mrb[24].mxu1 %v6819_v57  ;;  %4509 = vmatprep.subr.bf16.mxu0 %v6330_v42  ;;  %v6346_v57 = vld [vmem:[#allocation10 + $0x4d0] ss:$12 sps:$4 sm:$0xff]   ;;  %v6376_v42 = vld [vmem:[#allocation10 + $0x620] ss:$12 sps:$4 sm:$0xff]  }
 0x23e   :  { %5550 = vmatpush3.bf16.msra.mxu1 %v6331_v43  ;;  %v6377_v43 = vld [vmem:[#allocation10 + $0x6f8] ss:$12 sps:$4 sm:$0xff]  }
 0x23f   :  { %5551 = vmatprep.subr.bf16.mxu1 %v6332_v44  ;;  %v6373_v44 = vld [vmem:[#allocation10 + $0x570] ss:$12 sps:$4 sm:$0xff]  }
 0x240   :  { %4510 = vmatpush1.bf16.msra.mxu0 %v6328_v45  ;;  %v6380_v45 = vld [vmem:[#allocation10 + $0x58c] ss:$12 sps:$4 sm:$0xff]  }
 0x241   :  { %4511 = vmatprep.subr.bf16.mxu0 %v6335_v46  ;;  %v6381_v46 = vld [vmem:[#allocation10 + $0x638] ss:$12 sps:$4 sm:$0xff]  }
 0x242   :  { %5552 = vmatpush3.bf16.msra.mxu1 %v6336_v47  ;;  %v6382_v47 = vld [vmem:[#allocation10 + $0x710] ss:$12 sps:$4 sm:$0xff]  }
 0x243   :  { %5553 = vmatprep.subr.bf16.mxu1 %v6337_v48  ;;  %v6378_v48 = vld [vmem:[#allocation10 + $0x588] ss:$12 sps:$4 sm:$0xff]  }
 0x244   :  { %4512 = vmatpush1.bf16.msra.mxu0 %v6333_v50  ;;  %v6385_v50 = vld [vmem:[#allocation10 + $0x5a4] ss:$12 sps:$4 sm:$0xff]  }
 0x245   :  { %4513 = vmatprep.subr.bf16.mxu0 %v6340_v54  ;;  %v6386_v54 = vld [vmem:[#allocation10 + $0x650] ss:$12 sps:$4 sm:$0xff]  }
 0x246   :  { %5554 = vmatpush3.bf16.msra.mxu1 %v6341_v14  ;;  %v6387_v14 = vld [vmem:[#allocation10 + $0x728] ss:$12 sps:$4 sm:$0xff]  }
 0x247   :  { %5555 = vmatprep.subr.bf16.mxu1 %v6342_v55  ;;  %v6383_v55 = vld [vmem:[#allocation10 + $0x5a0] ss:$12 sps:$4 sm:$0xff]  }
 0x248   :  { %4514 = vmatpush1.bf16.msra.mxu0 %v6338_v58  ;;  %v6390_v58 = vld [vmem:[#allocation10 + $0x5bc] ss:$12 sps:$4 sm:$0xff]  }
 0x249   :  { %4515 = vmatprep.subr.bf16.mxu0 %v6345_v62  ;;  %v6391_v62 = vld [vmem:[#allocation10 + $0x668] ss:$12 sps:$4 sm:$0xff]  }
 0x24a   :  { %5556 = vmatpush3.bf16.msra.mxu1 %v6346_v57  ;;  %v6392_v57 = vld [vmem:[#allocation10 + $0x740] ss:$12 sps:$4 sm:$0xff]  }
 0x24b   :  { %5557 = vmatprep.subr.bf16.mxu1 %v6347_v63  ;;  %v6388_v63 = vld [vmem:[#allocation10 + $0x5b8] ss:$12 sps:$4 sm:$0xff]  }
 0x24c   :  { %4516 = vmatpush1.bf16.msra.mxu0 %v6343_v0  ;;  %v6395_v0 = vld [vmem:[#allocation10 + $0x5d4] ss:$12 sps:$4 sm:$0xff]  }
 0x24d   :  { %4517 = vmatprep.subr.bf16.mxu0 %v6350_v1  ;;  %v6396_v1 = vld [vmem:[#allocation10 + $0x680] ss:$12 sps:$4 sm:$0xff]  }
 0x24e   :  { %5558 = vmatpush3.bf16.msra.mxu1 %v6351_v4  ;;  %v6393_v4 = vld [vmem:[#allocation10 + $0x5d0] ss:$12 sps:$4 sm:$0xff]  }
 0x24f   :  { %5559 = vmatprep.subr.bf16.mxu1 %v6352_v6  ;;  %v6401_v6 = vld [vmem:[#allocation10 + $0x698] ss:$12 sps:$4 sm:$0xff]  }
 0x250   :  { %4518 = vmatpush1.bf16.msra.mxu0 %v6348_v7  ;;  %v2224_v16 = vpop.f32.mrb[8].mxu1  ;;  %v6402_v7 = vld [vmem:[#allocation10 + $0x770] ss:$12 sps:$4 sm:$0xff]  }
 0x251   :  { %v5627_v18 = vadd.f32 %v2224_v16, %v416_v9  ;;  %v2226_v19 = vpop.f32.mrb[9].mxu1  ;;  %4519 = vmatprep.subr.bf16.mxu0 %v6355_v10  ;;  %v6406_v10 = vld [vmem:[#allocation10 + $0x6b0] ss:$12 sps:$4 sm:$0xff]   ;;  %v6432_v16 = vld [vmem:[#allocation10 + $0x788] ss:$12 sps:$4 sm:$0xff]  }
 0x252   :  { %v5628_v22 = vadd.f32 %v2226_v19, %v420_v11  ;;  %v2228_v23 = vpop.f32.mrb[10].mxu1  ;;  %5560 = vmatpush3.bf16.msra.mxu1 %v6356_v12  ;;  %v6403_v12 = vld [vmem:[#allocation10 + $0x600] ss:$12 sps:$4 sm:$0xff]  }
 0x253   :  { %v2411_v15 = vmax.f32 %v5627_v18, 0.0  ;;  %v5629_v61 = vadd.f32 %v2228_v23, %v416_v9  ;;  %v2230_v25 = vpop.f32.mrb[11].mxu1  ;;  %5561 = vmatprep.subr.bf16.mxu1 %v6357_v52  ;;  %v6405_v9 = vld [vmem:[#allocation10 + $0x604] ss:$12 sps:$4 sm:$0xff]   ;;  %v6409_v52 = vld [vmem:[#allocation10 + $0x61c] ss:$12 sps:$4 sm:$0xff]  }
 0x254   :  { %v5630_v3 = vadd.f32 %v2230_v25, %v420_v11  ;;  %4520 = vmatpush1.bf16.msra.mxu0 %v6353_v17  ;;  %v2412_v13 = vmax.f32 %v5628_v22, 0.0  ;;  %v6431_v11 = vld [vmem:[#allocation10 + $0x848] ss:$12 sps:$4 sm:$0xff]   ;;  %v6436_v17 = vld [vmem:[#allocation10 + $0x860] ss:$12 sps:$4 sm:$0xff]  }
 0x255   :  { %v2423_v28 = vmax.f32 %v5629_v61, 0.0  ;;  %4521 = vmatprep.subr.bf16.mxu0 %v6360_v21  ;;  %v6407_v18 = vld [vmem:[#allocation10 + $0x618] ss:$12 sps:$4 sm:$0xff]   ;;  %v6412_v19 = vld [vmem:[#allocation10 + $0x634] ss:$12 sps:$4 sm:$0xff]  }
 0x256   :  { %v2424_v30 = vmax.f32 %v5630_v3, 0.0  ;;  %5562 = vmatpush3.bf16.msra.mxu1 %v6361_v24  ;;  %v6437_v21 = vld [vmem:[#allocation10 + $0x7a0] ss:$12 sps:$4 sm:$0xff]   ;;  %v6441_v22 = vld [vmem:[#allocation10 + $0x878] ss:$12 sps:$4 sm:$0xff]  }
 0x257   :  { %v6857_v32 = vpack.c.bf16 %v2423_v28, %v2411_v15  ;;  %5563 = vmatprep.subr.bf16.mxu1 %v6362_v60  ;;  %v6410_v23 = vld [vmem:[#allocation10 + $0x630] ss:$12 sps:$4 sm:$0xff]   ;;  %v6415_v24 = vld [vmem:[#allocation10 + $0x64c] ss:$12 sps:$4 sm:$0xff]   ;;  %v6413_v25 = vld [vmem:[#allocation10 + $0x648] ss:$12 sps:$4 sm:$0xff]  }
 0x258   :  { %v2436_v35 = vpack.c.bf16 %v2424_v30, %v2412_v13  ;;  %4522 = vmatpush1.bf16.msra.mxu0 %v6358_v27  ;;  %v6442_v15 = vld [vmem:[#allocation10 + $0x7b8] ss:$12 sps:$4 sm:$0xff]   ;;  %v6446_v61 = vld [vmem:[#allocation10 + $0x890] ss:$12 sps:$4 sm:$0xff]   ;;  %v6451_v3 = vld [vmem:[#allocation10 + $0x8a8] ss:$12 sps:$4 sm:$0xff]  }
 0x259   :  { %4523 = vmatprep.subr.bf16.mxu0 %v6365_v29  ;;  %v6447_v60 = vld [vmem:[#allocation10 + $0x7d0] ss:$12 sps:$4 sm:$0xff]   ;;  %v6416_v27 = vld [vmem:[#allocation10 + $0x660] ss:$12 sps:$4 sm:$0xff]   ;;  %v6452_v29 = vld [vmem:[#allocation10 + $0x7e8] ss:$12 sps:$4 sm:$0xff]  }
 0x25a   :  { %4539 = vmatprep.mubr.bf16.mxu0 %v2436_v35  ;;  %5564 = vmatpush3.bf16.msra.mxu1 %v6366_v31  ;;  %v6421_v28 = vld [vmem:[#allocation10 + $0x67c] ss:$12 sps:$4 sm:$0xff]   ;;  %v6456_v13 = vld [vmem:[#allocation10 + $0x8c0] ss:$12 sps:$4 sm:$0xff]   ;;  %v6419_v30 = vld [vmem:[#allocation10 + $0x678] ss:$12 sps:$4 sm:$0xff]  }
 0x25b   :  { %4791 = vmatprep.mubr.bf16.mxu1 %v2436_v35  ;;  %5571 = vmatprep.subr.bf16.mxu1 %v6367_v33  ;;  %v6424_v31 = vld [vmem:[#allocation10 + $0x694] ss:$12 sps:$4 sm:$0xff]   ;;  %v6461_v33 = vld [vmem:[#allocation10 + $0x8d8] ss:$12 sps:$4 sm:$0xff]   ;;  %v6422_v35 = vld [vmem:[#allocation10 + $0x690] ss:$12 sps:$4 sm:$0xff]  }
 0x25c   :  { %4524 = vmatpush1.bf16.msra.mxu0 %v6363_v36  ;;  %v6427_v36 = vld [vmem:[#allocation10 + $0x6ac] ss:$12 sps:$4 sm:$0xff]  }
 0x25d   :  { %4792 = vmatmul.mubr.bf16.vlgmr.msra.gmra.mrb[28].mxu1 %v6857_v32  ;;  %4525 = vmatprep.subr.bf16.mxu0 %v6370_v37  ;;  %v6462_v37 = vld [vmem:[#allocation10 + $0x818] ss:$12 sps:$4 sm:$0xff]  }
 0x25e   :  { %5572 = vmatpush3.bf16.msra.mxu1 %v6371_v38  ;;  %4832 = vmatprep.mubr.bf16.mxu1 %v6849_v59  ;;  %v6466_v38 = vld [vmem:[#allocation10 + $0x8f0] ss:$12 sps:$4 sm:$0xff]  }
 0x25f   :  { %5573 = vmatprep.subr.bf16.mxu1 %v6372_v39  ;;  %v6425_v39 = vld [vmem:[#allocation10 + $0x6a8] ss:$12 sps:$4 sm:$0xff]  }
 0x260   :  { %4526 = vmatpush1.bf16.msra.mxu0 %v6368_v40  ;;  %v6430_v40 = vld [vmem:[#allocation10 + $0x6c4] ss:$12 sps:$4 sm:$0xff]  }
 0x261   :  { %4527 = vmatprep.subr.bf16.mxu0 %v6375_v41  ;;  %v6467_v41 = vld [vmem:[#allocation10 + $0x830] ss:$12 sps:$4 sm:$0xff]  }
 0x262   :  { %5574 = vmatpush3.bf16.msra.mxu1 %v6376_v42  ;;  %v6428_v42 = vld [vmem:[#allocation10 + $0x6c0] ss:$12 sps:$4 sm:$0xff]  }
 0x263   :  { %5575 = vmatprep.subr.bf16.mxu1 %v6377_v43  ;;  %v6435_v43 = vld [vmem:[#allocation10 + $0x6dc] ss:$12 sps:$4 sm:$0xff]  }
 0x264   :  { %4528 = vmatpush1.bf16.msra.mxu0 %v6373_v44  ;;  %v6433_v44 = vld [vmem:[#allocation10 + $0x6d8] ss:$12 sps:$4 sm:$0xff]  }
 0x265   :  { %4529 = vmatprep.subr.bf16.mxu0 %v6380_v45  ;;  %v6440_v45 = vld [vmem:[#allocation10 + $0x6f4] ss:$12 sps:$4 sm:$0xff]  }
 0x266   :  { %5576 = vmatpush3.bf16.msra.mxu1 %v6381_v46  ;;  %v6438_v46 = vld [vmem:[#allocation10 + $0x6f0] ss:$12 sps:$4 sm:$0xff]  }
 0x267   :  { %5577 = vmatprep.subr.bf16.mxu1 %v6382_v47  ;;  %v6445_v47 = vld [vmem:[#allocation10 + $0x70c] ss:$12 sps:$4 sm:$0xff]  }
 0x268   :  { %4530 = vmatpush1.bf16.msra.mxu0 %v6378_v48  ;;  %v6443_v48 = vld [vmem:[#allocation10 + $0x708] ss:$12 sps:$4 sm:$0xff]  }
 0x269   :  { %4531 = vmatprep.subr.bf16.mxu0 %v6385_v50  ;;  %v6450_v50 = vld [vmem:[#allocation10 + $0x724] ss:$12 sps:$4 sm:$0xff]  }
 0x26a   :  { %5578 = vmatpush3.bf16.msra.mxu1 %v6386_v54  ;;  %v6448_v54 = vld [vmem:[#allocation10 + $0x720] ss:$12 sps:$4 sm:$0xff]  }
 0x26b   :  { %5579 = vmatprep.subr.bf16.mxu1 %v6387_v14  ;;  %v6455_v14 = vld [vmem:[#allocation10 + $0x73c] ss:$12 sps:$4 sm:$0xff]  }
 0x26c   :  { %4532 = vmatpush1.bf16.msra.mxu0 %v6383_v55  ;;  %v6453_v55 = vld [vmem:[#allocation10 + $0x738] ss:$12 sps:$4 sm:$0xff]  }
 0x26d   :  { %4533 = vmatprep.subr.bf16.mxu0 %v6390_v58  ;;  %v432_v58 = vrot.slane %v6841_v26, %v6828_v51 }
 0x26e   :  { %5580 = vmatpush3.bf16.msra.mxu1 %v6391_v62  ;;  %v6460_v62 = vld [vmem:[#allocation10 + $0x754] ss:$12 sps:$4 sm:$0xff]  }
 0x26f   :  { %5581 = vmatprep.subr.bf16.mxu1 %v6392_v57  ;;  %v436_v57 = vrot.slane %v6841_v26, %v403_v34 }
 0x270   :  { %4534 = vmatpush1.bf16.msra.mxu0 %v6388_v63 }
 0x271   :  { %4535 = vmatprep.subr.bf16.mxu0 %v6395_v0  ;;  %v6458_v0 = vld [vmem:[#allocation10 + $0x750] ss:$12 sps:$4 sm:$0xff]  }
 0x272   :  { %5582 = vmatpush3.bf16.msra.mxu1 %v6396_v1 }
 0x273   :  { %5583 = vmatprep.subr.bf16.mxu1 %v6397_v2 }
 0x274   :  { %4536 = vmatpush1.bf16.msra.mxu0 %v6393_v4  ;;  %v6465_v4 = vld [vmem:[#allocation10 + $0x76c] ss:$12 sps:$4 sm:$0xff]  }
 0x275   :  { %4537 = vmatprep.subr.bf16.mxu0 %v6400_v5 }
 0x276   :  { %5584 = vmatpush3.bf16.msra.mxu1 %v6401_v6 }
 0x277   :  { %5585 = vmatprep.subr.bf16.mxu1 %v6402_v7 }
 0x278   :  { %4538 = vmatpush1.bf16.msra.mxu0 %v6398_v8 }
 0x279   :  { %4550 = vmatprep.subr.bf16.mxu0 %v6405_v9 }
 0x27a   :  { %5586 = vmatpush3.bf16.msra.mxu1 %v6406_v10 }
 0x27b   :  { %4540 = vmatmul.mubr.bf16.vlgmr.msra.gmra.mrb[8].mxu0 %v6857_v32  ;;  %5593 = vmatprep.subr.bf16.mxu1 %v6431_v11  ;;  %v6457_v32 = vld [vmem:[#allocation10 + $0x800] ss:$12 sps:$4 sm:$0xff]  }
 0x27c   :  { %4551 = vmatpush1.bf16.msra.mxu0 %v6403_v12  ;;  %4582 = vmatprep.mubr.bf16.mxu0 %v6849_v59  ;;  %v6418_v59 = vld [vmem:[#allocation10 + $0x664] ss:$12 sps:$4 sm:$0xff]   ;;  %v6463_v12 = vld [vmem:[#allocation10 + $0x768] ss:$12 sps:$4 sm:$0xff]  }
 0x27d   :  { %4833 = vmatmul.mubr.bf16.vlgmr.msra.gmra.mrb[32].mxu1 %v6847_v56  ;;  %4552 = vmatprep.subr.bf16.mxu0 %v6409_v52 }
 0x27e   :  { %5594 = vmatpush3.bf16.msra.mxu1 %v6432_v16 }
 0x27f   :  { %5595 = vmatprep.subr.bf16.mxu1 %v6436_v17  ;;  %v6468_v17 = vld [vmem:[#allocation10 + $0x780] ss:$12 sps:$4 sm:$0xff]  }
 0x280   :  { %4553 = vmatpush1.bf16.msra.mxu0 %v6407_v18  ;;  %v6473_v18 = vld [vmem:[#allocation10 + $0x79c] ss:$12 sps:$4 sm:$0xff]  }
 0x281   :  { %4554 = vmatprep.subr.bf16.mxu0 %v6412_v19  ;;  %v6471_v19 = vld [vmem:[#allocation10 + $0x798] ss:$12 sps:$4 sm:$0xff]  }
 0x282   :  { %5596 = vmatpush3.bf16.msra.mxu1 %v6437_v21  ;;  %v6476_v21 = vld [vmem:[#allocation10 + $0x7b4] ss:$12 sps:$4 sm:$0xff]  }
 0x283   :  { %5597 = vmatprep.subr.bf16.mxu1 %v6441_v22  ;;  %v6474_v22 = vld [vmem:[#allocation10 + $0x7b0] ss:$12 sps:$4 sm:$0xff]  }
 0x284   :  { %4555 = vmatpush1.bf16.msra.mxu0 %v6410_v23  ;;  %v6479_v23 = vld [vmem:[#allocation10 + $0x7cc] ss:$12 sps:$4 sm:$0xff]  }
 0x285   :  { %4556 = vmatprep.subr.bf16.mxu0 %v6415_v24  ;;  %v6477_v24 = vld [vmem:[#allocation10 + $0x7c8] ss:$12 sps:$4 sm:$0xff]  }
 0x286   :  { %5598 = vmatpush3.bf16.msra.mxu1 %v6442_v15  ;;  %v6482_v15 = vld [vmem:[#allocation10 + $0x7e4] ss:$12 sps:$4 sm:$0xff]  }
 0x287   :  { %5599 = vmatprep.subr.bf16.mxu1 %v6446_v61  ;;  %v6480_v61 = vld [vmem:[#allocation10 + $0x7e0] ss:$12 sps:$4 sm:$0xff]  }
 0x288   :  { %4557 = vmatpush1.bf16.msra.mxu0 %v6413_v25  ;;  %v6485_v25 = vld [vmem:[#allocation10 + $0x7fc] ss:$12 sps:$4 sm:$0xff]  }
 0x289   :  { %4558 = vmatprep.subr.bf16.mxu0 %v6418_v59  ;;  %v6488_v59 = vld [vmem:[#allocation10 + $0x814] ss:$12 sps:$4 sm:$0xff]  }
 0x28a   :  { %5600 = vmatpush3.bf16.msra.mxu1 %v6447_v60 }
 0x28b   :  { %5601 = vmatprep.subr.bf16.mxu1 %v6451_v3  ;;  %v6486_v3 = vld [vmem:[#allocation10 + $0x810] ss:$12 sps:$4 sm:$0xff]  }
 0x28c   :  { %4559 = vmatpush1.bf16.msra.mxu0 %v6416_v27 }
 0x28d   :  { %4560 = vmatprep.subr.bf16.mxu0 %v6421_v28  ;;  %v6491_v28 = vld [vmem:[#allocation10 + $0x82c] ss:$12 sps:$4 sm:$0xff]  }
 0x28e   :  { %5602 = vmatpush3.bf16.msra.mxu1 %v6452_v29 }
 0x28f   :  { %5603 = vmatprep.subr.bf16.mxu1 %v6456_v13 }
 0x290   :  { %4561 = vmatpush1.bf16.msra.mxu0 %v6419_v30 }
 0x291   :  { %4562 = vmatprep.subr.bf16.mxu0 %v6424_v31 }
 0x292   :  { %5604 = vmatpush3.bf16.msra.mxu1 %v6457_v32  ;;  %v6489_v32 = vld [vmem:[#allocation10 + $0x828] ss:$12 sps:$4 sm:$0xff]  }
 0x293   :  { %5605 = vmatprep.subr.bf16.mxu1 %v6461_v33  ;;  %v6494_v33 = vld [vmem:[#allocation10 + $0x844] ss:$12 sps:$4 sm:$0xff]  }
 0x294   :  { %4563 = vmatpush1.bf16.msra.mxu0 %v6422_v35  ;;  %v6492_v35 = vld [vmem:[#allocation10 + $0x840] ss:$12 sps:$4 sm:$0xff]  }
 0x295   :  { %4564 = vmatprep.subr.bf16.mxu0 %v6427_v36  ;;  %v6497_v36 = vld [vmem:[#allocation10 + $0x85c] ss:$12 sps:$4 sm:$0xff]  }
 0x296   :  { %5606 = vmatpush3.bf16.msra.mxu1 %v6462_v37  ;;  %v6495_v37 = vld [vmem:[#allocation10 + $0x858] ss:$12 sps:$4 sm:$0xff]  }
 0x297   :  { %5607 = vmatprep.subr.bf16.mxu1 %v6466_v38  ;;  %v6500_v38 = vld [vmem:[#allocation10 + $0x874] ss:$12 sps:$4 sm:$0xff]  }
 0x298   :  { %4565 = vmatpush1.bf16.msra.mxu0 %v6425_v39  ;;  %v6498_v39 = vld [vmem:[#allocation10 + $0x870] ss:$12 sps:$4 sm:$0xff]  }
 0x299   :  { %4566 = vmatprep.subr.bf16.mxu0 %v6430_v40  ;;  %v6503_v40 = vld [vmem:[#allocation10 + $0x88c] ss:$12 sps:$4 sm:$0xff]  }
 0x29a   :  { %5608 = vmatpush3.bf16.msra.mxu1 %v6467_v41  ;;  %v6501_v41 = vld [vmem:[#allocation10 + $0x888] ss:$12 sps:$4 sm:$0xff]  }
 0x29c   :  { %4567 = vmatpush1.bf16.msra.mxu0 %v6428_v42  ;;  %v6506_v42 = vld [vmem:[#allocation10 + $0x8a4] ss:$12 sps:$4 sm:$0xff]  }
 0x29d   :  { %4568 = vmatprep.subr.bf16.mxu0 %v6435_v43  ;;  %v6504_v43 = vld [vmem:[#allocation10 + $0x8a0] ss:$12 sps:$4 sm:$0xff]  }
 0x2a0   :  { %4569 = vmatpush1.bf16.msra.mxu0 %v6433_v44  ;;  %v6509_v44 = vld [vmem:[#allocation10 + $0x8bc] ss:$12 sps:$4 sm:$0xff]  }
 0x2a1   :  { %4570 = vmatprep.subr.bf16.mxu0 %v6440_v45  ;;  %v2825_v45 = vld [vmem:[#allocation12] sm:$0x7] }
 0x2a4   :  { %4571 = vmatpush1.bf16.msra.mxu0 %v6438_v46  ;;  %v6507_v46 = vld [vmem:[#allocation10 + $0x8b8] ss:$12 sps:$4 sm:$0xff]  }
 0x2a5   :  { %4572 = vmatprep.subr.bf16.mxu0 %v6445_v47  ;;  %v6512_v47 = vld [vmem:[#allocation10 + $0x8d4] ss:$12 sps:$4 sm:$0xff]  }
 0x2a8   :  { %4573 = vmatpush1.bf16.msra.mxu0 %v6443_v48  ;;  %v2838_v48 = vrot.slane %v2825_v45, %v6828_v51 }
 0x2a9   :  { %4574 = vmatprep.subr.bf16.mxu0 %v6450_v50 }
 0x2ac   :  { %4575 = vmatpush1.bf16.msra.mxu0 %v6448_v54  ;;  %v6510_v54 = vld [vmem:[#allocation10 + $0x8d0] ss:$12 sps:$4 sm:$0xff]  }
 0x2ad   :  { %4576 = vmatprep.subr.bf16.mxu0 %v6455_v14 }
 0x2b0   :  { %4577 = vmatpush1.bf16.msra.mxu0 %v6453_v55  ;;  %v2396_v63 = vpop.f32.mrb[12].mxu1  ;;  %v6515_v55 = vld [vmem:[#allocation10 + $0x8ec] ss:$12 sps:$4 sm:$0xff]  }
 0x2b1   :  { %v5635_v1 = vadd.f32 %v2396_v63, %v432_v58  ;;  %v2398_v2 = vpop.f32.mrb[13].mxu1  ;;  %4578 = vmatprep.subr.bf16.mxu0 %v6460_v62 }
 0x2b2   :  { %v5636_v5 = vadd.f32 %v2398_v2, %v436_v57  ;;  %v2400_v6 = vpop.f32.mrb[14].mxu1 }
 0x2b3   :  { %v2415_v7 = vmax.f32 %v5635_v1, 0.0  ;;  %v5637_v8 = vadd.f32 %v2400_v6, %v432_v58  ;;  %v2402_v9 = vpop.f32.mrb[15].mxu1 }
 0x2b4   :  { %v2416_v10 = vmax.f32 %v5636_v5, 0.0  ;;  %v5638_v11 = vadd.f32 %v2402_v9, %v436_v57  ;;  %4579 = vmatpush1.bf16.msra.mxu0 %v6458_v0 }
 0x2b5   :  { %v2427_v52 = vmax.f32 %v5637_v8, 0.0  ;;  %4580 = vmatprep.subr.bf16.mxu0 %v6465_v4  ;;  %v6513_v4 = vld [vmem:[#allocation10 + $0x8e8] ss:$12 sps:$4 sm:$0xff]  }
 0x2b6   :  { %v2428_v34 = vmax.f32 %v5638_v11, 0.0 }
 0x2b7   :  { %v6869_v26 = vpack.c.bf16 %v2427_v52, %v2415_v7 }
 0x2b8   :  { %v2440_v16 = vpack.c.bf16 %v2428_v34, %v2416_v10  ;;  %4581 = vmatpush1.bf16.msra.mxu0 %v6463_v12 }
 0x2b9   :  { %4593 = vmatprep.subr.bf16.mxu0 %v6470_v49 }
 0x2ba   :  { %4873 = vmatprep.mubr.bf16.mxu1 %v2440_v16 }
 0x2bb   :  { %4583 = vmatmul.mubr.bf16.vlgmr.msra.gmra.mrb[8].mxu0 %v6847_v56  ;;  %4874 = vmatmul.mubr.bf16.vlgmr.msra.gmra.mrb[36].mxu1 %v6869_v26  ;;  %v6483_v56 = vld [vmem:[#allocation10 + $0x7f8] ss:$12 sps:$4 sm:$0xff]  }
 0x2bc   :  { %4594 = vmatpush1.bf16.msra.mxu0 %v6468_v17  ;;  %4625 = vmatprep.mubr.bf16.mxu0 %v2440_v16 }
 0x2bd   :  { %4595 = vmatprep.subr.bf16.mxu0 %v6473_v18 }
 0x2c0   :  { %4596 = vmatpush1.bf16.msra.mxu0 %v6471_v19 }
 0x2c1   :  { %4597 = vmatprep.subr.bf16.mxu0 %v6476_v21 }
 0x2c4   :  { %4598 = vmatpush1.bf16.msra.mxu0 %v6474_v22 }
 0x2c5   :  { %4599 = vmatprep.subr.bf16.mxu0 %v6479_v23 }
 0x2c8   :  { %4600 = vmatpush1.bf16.msra.mxu0 %v6477_v24 }
 0x2c9   :  { %4601 = vmatprep.subr.bf16.mxu0 %v6482_v15 }
 0x2cc   :  { %4602 = vmatpush1.bf16.msra.mxu0 %v6480_v61 }
 0x2cd   :  { %4603 = vmatprep.subr.bf16.mxu0 %v6485_v25 }
 0x2d0   :  { %4604 = vmatpush1.bf16.msra.mxu0 %v6483_v56  ;;  %v5499_v60 = vpop.f32.mrb[16].mxu1 }
 0x2d1   :  { %v5500_v27 = vpop.f32.mrb[17].mxu1  ;;  %4605 = vmatprep.subr.bf16.mxu0 %v6488_v59 }
 0x2d2   :  { %v5501_v29 = vadd.f32 %v5500_v27, %v5499_v60  ;;  %v5502_v13 = vpop.f32.mrb[18].mxu1 }
 0x2d3   :  { %v5503_v30 = vpop.f32.mrb[19].mxu1 }
 0x2d4   :  { %4606 = vmatpush1.bf16.msra.mxu0 %v6486_v3  ;;  %v5504_v31 = vadd.f32 %v5503_v30, %v5502_v13  ;;  %v4671_v58 = vadd.f32 %v5501_v29, %v2838_v48 }
 0x2d5   :  { %4607 = vmatprep.subr.bf16.mxu0 %v6491_v28 }
 0x2d6   :  { %v4674_v0 = vadd.f32 %v5504_v31, %v2838_v48  ;;  %v2830_v31 = vrot.slane %v2825_v45, %v6800_v53 }
 0x2d8   :  { %4608 = vmatpush1.bf16.msra.mxu0 %v6489_v32  ;;  %v2834_v32 = vrot.slane %v2825_v45, %v6803_v20 }
 0x2d9   :  { %4609 = vmatprep.subr.bf16.mxu0 %v6494_v33 }
 0x2dc   :  { %4610 = vmatpush1.bf16.msra.mxu0 %v6492_v35 }
 0x2dd   :  { %4611 = vmatprep.subr.bf16.mxu0 %v6497_v36 }
 0x2e0   :  { %4612 = vmatpush1.bf16.msra.mxu0 %v6495_v37 }
 0x2e1   :  { %4613 = vmatprep.subr.bf16.mxu0 %v6500_v38 }
 0x2e4   :  { %4614 = vmatpush1.bf16.msra.mxu0 %v6498_v39 }
 0x2e5   :  { %4615 = vmatprep.subr.bf16.mxu0 %v6503_v40 }
 0x2e8   :  { %4616 = vmatpush1.bf16.msra.mxu0 %v6501_v41 }
 0x2e9   :  { %4617 = vmatprep.subr.bf16.mxu0 %v6506_v42 }
 0x2ec   :  { %4618 = vmatpush1.bf16.msra.mxu0 %v6504_v43 }
 0x2ed   :  { %4619 = vmatprep.subr.bf16.mxu0 %v6509_v44 }
 0x2f0   :  { %4620 = vmatpush1.bf16.msra.mxu0 %v6507_v46  ;;  %v5521_v50 = vpop.f32.mrb[20].mxu1 }
 0x2f1   :  { %v5522_v14 = vpop.f32.mrb[21].mxu1  ;;  %4621 = vmatprep.subr.bf16.mxu0 %v6512_v47 }
 0x2f2   :  { %v5523_v62 = vadd.f32 %v5522_v14, %v5521_v50  ;;  %v5524_v57 = vpop.f32.mrb[22].mxu1 }
 0x2f3   :  { %v5525_v63 = vpop.f32.mrb[23].mxu1 }
 0x2f4   :  { %v4712_v1 = vadd.f32 %v5523_v62, %v4671_v58  ;;  %4622 = vmatpush1.bf16.msra.mxu0 %v6510_v54  ;;  %v5526_v2 = vadd.f32 %v5525_v63, %v5524_v57 }
 0x2f5   :  { %4623 = vmatprep.subr.bf16.mxu0 %v6515_v55 }
 0x2f6   :  { %v4715_v5 = vadd.f32 %v5526_v2, %v4674_v0 }
 0x2f8   :  { %4624 = vmatpush1.bf16.msra.mxu0 %v6513_v4 }
 0x2fb   :  { %4626 = vmatmul.mubr.bf16.vlgmr.msra.gmra.mrb[8].mxu0 %v6869_v26 }
 0x310   :  { %v5543_v51 = vpop.f32.mrb[24].mxu1 }
 0x311   :  { %v5544_v6 = vpop.f32.mrb[25].mxu1 }
 0x312   :  { %v5545_v7 = vadd.f32 %v5544_v6, %v5543_v51  ;;  %v5546_v8 = vpop.f32.mrb[26].mxu1 }
 0x313   :  { %v5547_v9 = vpop.f32.mrb[27].mxu1 }
 0x314   :  { %v4753_v10 = vadd.f32 %v5545_v7, %v4712_v1  ;;  %v5548_v11 = vadd.f32 %v5547_v9, %v5546_v8 }
 0x316   :  { %v4756_v12 = vadd.f32 %v5548_v11, %v4715_v5 }
 0x330   :  { %v5565_v52 = vpop.f32.mrb[28].mxu1 }
 0x331   :  { %v5566_v49 = vpop.f32.mrb[29].mxu1 }
 0x332   :  { %v5567_v34 = vadd.f32 %v5566_v49, %v5565_v52  ;;  %v5568_v16 = vpop.f32.mrb[30].mxu1 }
 0x333   :  { %v5569_v17 = vpop.f32.mrb[31].mxu1 }
 0x334   :  { %v4794_v18 = vadd.f32 %v5567_v34, %v4753_v10  ;;  %v5570_v19 = vadd.f32 %v5569_v17, %v5568_v16 }
 0x336   :  { %v4797_v21 = vadd.f32 %v5570_v19, %v4756_v12 }
 0x350   :  { %v5587_v22 = vpop.f32.mrb[32].mxu1 }
 0x351   :  { %v5588_v23 = vpop.f32.mrb[33].mxu1 }
 0x352   :  { %v5589_v24 = vadd.f32 %v5588_v23, %v5587_v22  ;;  %v5590_v26 = vpop.f32.mrb[34].mxu1 }
 0x353   :  { %v5591_v15 = vpop.f32.mrb[35].mxu1 }
 0x354   :  { %v4835_v61 = vadd.f32 %v5589_v24, %v4794_v18  ;;  %v5592_v25 = vadd.f32 %v5591_v15, %v5590_v26 }
 0x356   :  { %v4838_v56 = vadd.f32 %v5592_v25, %v4797_v21 }
 0x38e   :  { %v5609_v59 = vpop.f32.mrb[36].mxu1 }
 0x38f   :  { %v5610_v60 = vpop.f32.mrb[37].mxu1 }
 0x390   :  { %v5611_v3 = vadd.f32 %v5610_v60, %v5609_v59  ;;  %v5612_v27 = vpop.f32.mrb[38].mxu1 }
 0x391   :  { %v5613_v28 = vpop.f32.mrb[39].mxu1 }
 0x392   :  { %v4876_v29 = vadd.f32 %v5611_v3, %v4835_v61  ;;  %v5614_v13 = vadd.f32 %v5613_v28, %v5612_v27 }
 0x394   :  { %4884 = vst [vmem:[#allocation13 + $0x10] sm:$0xff] %v4876_v29  ;;  %v4879_v30 = vadd.f32 %v5614_v13, %v4838_v56 }
 0x396   :  { %4887 = vst [vmem:[#allocation13 + $0x28] sm:$0xff] %v4879_v30 }
 0x3ce   :  { %v4627_v33 = vpop.f32.mrb[8].mxu0 }
 0x3cf   :  { %v5639_v35 = vadd.f32 %v4627_v33, %v2830_v31  ;;  %v4629_v36 = vpop.f32.mrb[9].mxu0 }
 0x3d0   :  { %v5640_v37 = vadd.f32 %v4629_v36, %v2834_v32  ;;  %v4631_v38 = vpop.f32.mrb[10].mxu0 }
 0x3d1   :  { %4882 = vst [vmem:[#allocation13] sm:$0xff] %v5639_v35  ;;  %v5641_v39 = vadd.f32 %v4631_v38, %v2830_v31  ;;  %v4633_v40 = vpop.f32.mrb[11].mxu0 }
 0x3d2   :  { %4883 = vst [vmem:[#allocation13 + $0x8] sm:$0xff] %v5640_v37  ;;  %v5642_v41 = vadd.f32 %v4633_v40, %v2834_v32 }
 0x3d3   :  { %4885 = vst [vmem:[#allocation13 + $0x18] sm:$0xff] %v5641_v39 }
 0x3d4   :  { %4886 = vst [vmem:[#allocation13 + $0x20] sm:$0xff] %v5642_v41 }
 0x3d5   :  { %6638 = shalt.err (!%p6635_p2)
}
 0x3d6   :  { %s6639_s13 = scalar_lea.hbm %s6898_s6, 768 }
 0x3d7   :  { %p6640_p3 = scmp.ne.s32.totalorder %s6898_s6, %s6639_s13  ;;  %p6643_p4 = scmp.lt.u32.totalorder %s6639_s13, %s6898_s6 }
 0x3d9   :  { %p6645_p5 = pnand %p6643_p4, %p6640_p3 }
 0x3db   :  { %6648 = shalt.err (!%p6645_p5)
}
 0x3dc   :  { %4899 = dma.vmem_to_hbm [thread:$0]  %s4894_s9, 768, %s6898_s6, [#allocation6], %s6664_s4, %s6664_s4, %s6665_s8  }
 0x3dd   :  { %6655 = dma.done.wait [#allocation6], 768  }
 0x3de   :  { %6656 = vsyncadd [#allocation6], 4294966528 }
 0x3df   :  { %4903 = vsyncpa [#allocation5], 1 }
 0x3e0   :  { %4904 = vsyncpa [#allocation8], 1 }
 0x3e1   :  { %4905 = vsyncpa [#allocation11], 1 }
 0x3e2   :  { %4906 = vsyncpa [#allocation6], 1 }

</bundles_post_ra>
